<compile_context>
chip_gen: v5e
topology: v5e:2x2
jax: 0.10.0
libtpu: 0.0.40
codegen_flags: <defaults>
</compile_context>

<pallas_src>
import jax
import jax.numpy as jnp
from jax import lax
from jax.experimental import pallas as pl
from jax.experimental.pallas import tpu as pltpu


def _build_kernel(threshold1, threshold2):
    """K1: per destination-row tile, build the Jaccard-augmented adjacency (bf16 mask,
    self-loops included), its row degrees, and M1 = D^-1/2 (X @ W1)."""

    def kernel(attr_t_ref, attr_f_ref, nnz_ref, adj_ref, w1_ref,
               a_ref, deg_ref, m1_ref):
        tile = attr_t_ref.shape[0]
        n = adj_ref.shape[1]
        row0 = pl.program_id(0) * tile

        x_t = attr_t_ref[...]                                    # [T, d] f32 (0/1)
        x_f = attr_f_ref[...]                                    # [n, d] bf16 (0/1)

        # ---- Jaccard similarity, expressed as compares (no n^2 divides) ----
        inter = lax.dot_general(                                 # [T, n] intersections
            x_t.astype(jnp.bfloat16), x_f,
            (((1,), (1,)), ((), ())),
            preferred_element_type=jnp.float32)
        nnz_t = jnp.sum(x_t, axis=1, keepdims=True)              # [T, 1]
        denom = jnp.maximum(nnz_t + nnz_ref[...] - inter, 1.0)   # [T, n]
        keep = inter > threshold1 * denom                        # J > threshold1
        add = inter > threshold2 * denom                         # J > threshold2

        # ---- edge drop/add + remaining self loops ----
        orig = adj_ref[...].astype(jnp.float32) != 0.0
        edge = add | (keep & orig)
        rows = lax.broadcasted_iota(jnp.int32, (tile, n), 0) + row0
        cols = lax.broadcasted_iota(jnp.int32, (tile, n), 1)
        edge = edge | (rows == cols)

        a = jnp.where(edge, 1.0, 0.0)                            # [T, n] f32
        deg = jnp.sum(a, axis=1, keepdims=True)                  # [T, 1] (>= 1)
        dinv = lax.rsqrt(deg)                                    # EUP

        a_ref[...] = a.astype(jnp.bfloat16)
        deg_ref[...] = deg

        # ---- layer-1 feature transform, pre-scaled by D^-1/2 ----
        h0 = jnp.dot(x_t.astype(jnp.bfloat16), w1_ref[...],
                     preferred_element_type=jnp.float32)         # [T, hidden]
        m1_ref[...] = (dinv * h0).astype(jnp.bfloat16)

    return kernel


def _layer1_kernel(a_ref, m1_ref, deg_ref, w2_ref, m2_ref):
    """K2: H1 = relu(D^-1/2 A @ M1); M2 = D^-1/2 (H1 @ W2)."""
    agg = jnp.dot(a_ref[...], m1_ref[...],
                  preferred_element_type=jnp.float32)            # [T, hidden]
    dinv = lax.rsqrt(deg_ref[...])                               # [T, 1]
    h1 = jnp.maximum(dinv * agg, 0.0)                            # ReLU
    # TODO(synk): F.dropout(p=0.5) skipped -- eval-mode (training=False) identity.
    m2 = jnp.dot(h1.astype(jnp.bfloat16), w2_ref[...],
                 preferred_element_type=jnp.float32)             # [T, classes]
    m2_ref[...] = (dinv * m2).astype(jnp.bfloat16)


def _layer2_kernel(a_ref, m2_ref, deg_ref, b2_ref, out_ref):
    """K3: out = D^-1/2 (A @ M2) + b2."""
    agg = jnp.dot(a_ref[...], m2_ref[...],
                  preferred_element_type=jnp.float32)            # [T, classes]
    dinv = lax.rsqrt(deg_ref[...])
    out_ref[...] = dinv * agg + b2_ref[...]


def gcn_jaccard_forward(attr, adj, params, *, threshold1=0.1, threshold2=0.5):
    """Full GCNJaccard_Aug forward (eval mode).

    attr: [n, d] dense binary feature matrix; adj: [n, n] dense adjacency mask
    with adj[target, source] != 0 iff there is an edge source -> target.
    """
    n, d = attr.shape
    hidden = params["w1"].shape[1]
    classes = params["w2"].shape[1]
    tile = 128 if n % 128 == 0 else n                 # 128-row tiles (fits v7x VMEM)
    grid = (n // tile,)
    cparams = pltpu.CompilerParams(dimension_semantics=("parallel",))

    # Preprocessing mirroring set_jaccard_matrix: per-node nonzero feature counts.
    nnz = jnp.sum(attr != 0, axis=1, dtype=jnp.float32).reshape(1, n)
    attr_bf = attr.astype(jnp.bfloat16)
    adj_bf = adj.astype(jnp.bfloat16)                 # only used in compares
    w1_bf = params["w1"].astype(jnp.bfloat16)
    w2_bf = params["w2"].astype(jnp.bfloat16)

    # K1: augmented adjacency + degrees + M1 = D^-1/2 (X @ W1)
    a_aug, deg, m1 = pl.pallas_call(
        _build_kernel(threshold1, threshold2),
        grid=grid,
        in_specs=[
            pl.BlockSpec((tile, d), lambda i: (i, 0)),       # attr rows (f32)
            pl.BlockSpec((n, d), lambda i: (0, 0)),          # attr full (bf16), resident
            pl.BlockSpec((1, n), lambda i: (0, 0)),          # nonzero counts
            pl.BlockSpec((tile, n), lambda i: (i, 0)),       # original adjacency rows
            pl.BlockSpec((d, hidden), lambda i: (0, 0)),     # W1
        ],
        out_specs=[
            pl.BlockSpec((tile, n), lambda i: (i, 0)),       # A_aug rows (bf16)
            pl.BlockSpec((tile, 1), lambda i: (i, 0)),       # degrees
            pl.BlockSpec((tile, hidden), lambda i: (i, 0)),  # M1
        ],
        out_shape=[
            jax.ShapeDtypeStruct((n, n), jnp.bfloat16),
            jax.ShapeDtypeStruct((n, 1), jnp.float32),
            jax.ShapeDtypeStruct((n, hidden), jnp.bfloat16),
        ],
        compiler_params=cparams,
    )(attr, attr_bf, nnz, adj_bf, w1_bf)

    # K2: layer-1 aggregation + ReLU fused with the layer-2 feature transform.
    m2 = pl.pallas_call(
        _layer1_kernel,
        grid=grid,
        in_specs=[
            pl.BlockSpec((tile, n), lambda i: (i, 0)),       # A_aug rows
            pl.BlockSpec((n, hidden), lambda i: (0, 0)),     # M1 full, VMEM-resident
            pl.BlockSpec((tile, 1), lambda i: (i, 0)),
            pl.BlockSpec((hidden, classes), lambda i: (0, 0)),
        ],
        out_specs=pl.BlockSpec((tile, classes), lambda i: (i, 0)),
        out_shape=jax.ShapeDtypeStruct((n, classes), jnp.bfloat16),
        compiler_params=cparams,
    )(a_aug, m1, deg, w2_bf)

    # K3: layer-2 aggregation + bias (returned raw, as in the PyTorch forward).
    out = pl.pallas_call(
        _layer2_kernel,
        grid=grid,
        in_specs=[
            pl.BlockSpec((tile, n), lambda i: (i, 0)),
            pl.BlockSpec((n, classes), lambda i: (0, 0)),    # M2 full, VMEM-resident
            pl.BlockSpec((tile, 1), lambda i: (i, 0)),
            pl.BlockSpec((1, classes), lambda i: (0, 0)),
        ],
        out_specs=pl.BlockSpec((tile, classes), lambda i: (i, 0)),
        out_shape=jax.ShapeDtypeStruct((n, classes), jnp.float32),
        compiler_params=cparams,
    )(a_aug, m2, deg, params["b2"])
    return out


def reference_forward(attr, adj, params, threshold1, threshold2):
    """Pure-JAX reference mirroring the kernel math (incl. bf16 matmul inputs)."""
    n, _ = attr.shape
    attr_bf = attr.astype(jnp.bfloat16)
    nnz = jnp.sum(attr != 0, axis=1, dtype=jnp.float32)
    inter = jnp.dot(attr_bf, attr_bf.T, preferred_element_type=jnp.float32)
    denom = jnp.maximum(nnz[:, None] + nnz[None, :] - inter, 1.0)
    keep = inter > threshold1 * denom
    add = inter > threshold2 * denom
    edge = add | (keep & (adj != 0)) | jnp.eye(n, dtype=bool)
    a = edge.astype(jnp.float32)
    deg = jnp.sum(a, axis=1, keepdims=True)
    dinv = lax.rsqrt(deg)
    a_bf = a.astype(jnp.bfloat16)
    w1_bf = params["w1"].astype(jnp.bfloat16)
    w2_bf = params["w2"].astype(jnp.bfloat16)

    m1 = (dinv * jnp.dot(attr_bf, w1_bf,
                         preferred_element_type=jnp.float32)).astype(jnp.bfloat16)
    h1 = jnp.maximum(dinv * jnp.dot(a_bf, m1, preferred_element_type=jnp.float32), 0.0)
    m2 = (dinv * jnp.dot(h1.astype(jnp.bfloat16), w2_bf,
                         preferred_element_type=jnp.float32)).astype(jnp.bfloat16)
    return dinv * jnp.dot(a_bf, m2, preferred_element_type=jnp.float32) + params["b2"]


if __name__ == "__main__":
    n, d = 256, 64               # nodes, binary feature dimension
    n_hidden, n_classes = 32, 8
    t1, t2 = 0.1, 0.5            # Jaccard drop / add thresholds

    key = jax.random.PRNGKey(0)
    k_attr, k_adj, k_w1, k_w2, k_b2 = jax.random.split(key, 5)

    # Dense equivalent of attr_idx (binary sparse attribute matrix).
    attr = jax.random.bernoulli(k_attr, 0.2, (n, d)).astype(jnp.float32)

    # Dense equivalent of edge_idx (symmetric / undirected graph).
    up = jax.random.bernoulli(k_adj, 0.05, (n, n))
    adj = (up | up.T).astype(jnp.float32)

    glorot = lambda k, shape: (jax.random.normal(k, shape, jnp.float32)
                               * jnp.sqrt(2.0 / (shape[0] + shape[1])))
    params = {
        "w1": glorot(k_w1, (d, n_hidden)),              # conv1 weight (no bias used)
        "w2": glorot(k_w2, (n_hidden, n_classes)),      # conv2 weight
        "b2": 0.01 * jax.random.normal(k_b2, (1, n_classes), jnp.float32),
    }

    out = gcn_jaccard_forward(attr, adj, params, threshold1=t1, threshold2=t2)
    out = jax.block_until_ready(out)

    ref = reference_forward(attr, adj, params, t1, t2)

    assert out.shape == (n, n_classes)
    assert bool(jnp.all(jnp.isfinite(out)))
    assert bool(jnp.allclose(out, ref, atol=2e-2, rtol=2e-2))
    print("KERNEL_OK")
</pallas_src>

<mosaic_0001>
module attributes {stable_mosaic.version = 11 : i64} {
  func.func @kernel(%arg0: i32, %arg1: memref<128x64xf32, #tpu.memory_space<vmem>>, %arg2: memref<256x64xbf16, #tpu.memory_space<vmem>>, %arg3: memref<1x256xf32, #tpu.memory_space<vmem>>, %arg4: memref<128x256xbf16, #tpu.memory_space<vmem>>, %arg5: memref<64x32xbf16, #tpu.memory_space<vmem>>, %arg6: memref<128x256xbf16, #tpu.memory_space<vmem>>, %arg7: memref<128x1xf32, #tpu.memory_space<vmem>>, %arg8: memref<128x32xbf16, #tpu.memory_space<vmem>>) attributes {dimension_semantics = [#tpu.dimension_semantics<parallel>], iteration_bounds = array<i64: 2>, scalar_prefetch = 0 : i64, scratch_operands = 0 : i64, tpu.core_type = #tpu.core_type<tc>, window_params = [{transform_indices = @transform_0, window_bounds = array<i64: 128, 64>}, {pipeline_mode = #tpu.pipeline_mode<synchronous>, transform_indices = @transform_1, window_bounds = array<i64: 256, 64>}, {pipeline_mode = #tpu.pipeline_mode<synchronous>, transform_indices = @transform_2, window_bounds = array<i64: 1, 256>}, {transform_indices = @transform_3, window_bounds = array<i64: 128, 256>}, {pipeline_mode = #tpu.pipeline_mode<synchronous>, transform_indices = @transform_4, window_bounds = array<i64: 64, 32>}, {transform_indices = @transform_5, window_bounds = array<i64: 128, 256>}, {transform_indices = @transform_6, window_bounds = array<i64: 128, 1>}, {transform_indices = @transform_7, window_bounds = array<i64: 128, 32>}]} {
    %c128_i32 = arith.constant 128 : i32
    %0 = arith.muli %arg0, %c128_i32 : i32
    %c0 = arith.constant 0 : index
    %c0_0 = arith.constant 0 : index
    %1 = vector.load %arg1[%c0, %c0_0] : memref<128x64xf32, #tpu.memory_space<vmem>>, vector<128x64xf32>
    %c0_1 = arith.constant 0 : index
    %c0_2 = arith.constant 0 : index
    %2 = vector.load %arg2[%c0_1, %c0_2] : memref<256x64xbf16, #tpu.memory_space<vmem>>, vector<256x64xbf16>
    %3 = arith.truncf %1 : vector<128x64xf32> to vector<128x64xbf16>
    %cst = arith.constant dense<0.000000e+00> : vector<128x256xf32>
    %4 = tpu.matmul %3, %2, %cst {dimension_numbers = #tpu.dot_dimension_numbers<[1], [1], [0], [0], [0, 0, 1, 0], [], []>} : vector<128x64xbf16>, vector<256x64xbf16>, vector<128x256xf32> -> vector<128x256xf32>
    %cst_3 = arith.constant dense<0.000000e+00> : vector<128xf32>
    %5 = vector.multi_reduction <add>, %1, %cst_3 [1] : vector<128x64xf32> to vector<128xf32>
    %6 = vector.shape_cast %5 : vector<128xf32> to vector<128x1xf32>
    %c0_4 = arith.constant 0 : index
    %c0_5 = arith.constant 0 : index
    %7 = vector.load %arg3[%c0_4, %c0_5] : memref<1x256xf32, #tpu.memory_space<vmem>>, vector<1x256xf32>
    %8 = vector.broadcast %6 : vector<128x1xf32> to vector<128x256xf32>
    %9 = vector.broadcast %7 : vector<1x256xf32> to vector<128x256xf32>
    %10 = arith.addf %8, %9 : vector<128x256xf32>
    %11 = arith.subf %10, %4 : vector<128x256xf32>
    %cst_6 = arith.constant 1.000000e+00 : f32
    %12 = vector.broadcast %cst_6 : f32 to vector<128x256xf32>
    %13 = arith.maximumf %11, %12 : vector<128x256xf32>
    %cst_7 = arith.constant 1.000000e-01 : f32
    %14 = vector.broadcast %cst_7 : f32 to vector<128x256xf32>
    %15 = arith.mulf %14, %13 : vector<128x256xf32>
    %16 = arith.cmpf ogt, %4, %15 : vector<128x256xf32>
    %cst_8 = arith.constant 5.000000e-01 : f32
    %17 = vector.broadcast %cst_8 : f32 to vector<128x256xf32>
    %18 = arith.mulf %17, %13 : vector<128x256xf32>
    %19 = arith.cmpf ogt, %4, %18 : vector<128x256xf32>
    %c0_9 = arith.constant 0 : index
    %c0_10 = arith.constant 0 : index
    %20 = vector.load %arg4[%c0_9, %c0_10] : memref<128x256xbf16, #tpu.memory_space<vmem>>, vector<128x256xbf16>
    %21 = arith.extf %20 : vector<128x256xbf16> to vector<128x256xf32>
    %cst_11 = arith.constant 0.000000e+00 : f32
    %22 = vector.broadcast %cst_11 : f32 to vector<128x256xf32>
    %23 = arith.cmpf one, %21, %22 : vector<128x256xf32>
    %24 = arith.andi %16, %23 : vector<128x256xi1>
    %25 = arith.ori %19, %24 : vector<128x256xi1>
    %26 = tpu.iota {dimensions = array<i32: 0>} : vector<128x256xi32>
    %27 = vector.broadcast %0 : i32 to vector<128x256xi32>
    %28 = arith.addi %26, %27 : vector<128x256xi32>
    %29 = tpu.iota {dimensions = array<i32: 1>} : vector<128x256xi32>
    %30 = arith.cmpi eq, %28, %29 : vector<128x256xi32>
    %31 = arith.ori %25, %30 : vector<128x256xi1>
    %cst_12 = arith.constant 1.000000e+00 : f32
    %cst_13 = arith.constant 0.000000e+00 : f32
    %32 = vector.broadcast %cst_12 : f32 to vector<128x256xf32>
    %33 = vector.broadcast %cst_13 : f32 to vector<128x256xf32>
    %34 = arith.select %31, %32, %33 : vector<128x256xi1>, vector<128x256xf32>
    %cst_14 = arith.constant dense<0.000000e+00> : vector<128xf32>
    %35 = vector.multi_reduction <add>, %34, %cst_14 [1] : vector<128x256xf32> to vector<128xf32>
    %36 = vector.shape_cast %35 : vector<128xf32> to vector<128x1xf32>
    %37 = math.rsqrt %36 : vector<128x1xf32>
    %38 = arith.truncf %34 : vector<128x256xf32> to vector<128x256xbf16>
    %c0_15 = arith.constant 0 : index
    %c0_16 = arith.constant 0 : index
    %39 = vector.load %arg6[%c0_15, %c0_16] : memref<128x256xbf16, #tpu.memory_space<vmem>>, vector<128x256xbf16>
    tpu.vector_store %arg6[%c0_15, %c0_16], %38 {strides = array<i32>} : memref<128x256xbf16, #tpu.memory_space<vmem>>, vector<128x256xbf16>,
    %c0_17 = arith.constant 0 : index
    %c0_18 = arith.constant 0 : index
    %40 = vector.load %arg7[%c0_17, %c0_18] : memref<128x1xf32, #tpu.memory_space<vmem>>, vector<128x1xf32>
    tpu.vector_store %arg7[%c0_17, %c0_18], %36 {strides = array<i32>} : memref<128x1xf32, #tpu.memory_space<vmem>>, vector<128x1xf32>,
    %41 = arith.truncf %1 : vector<128x64xf32> to vector<128x64xbf16>
    %c0_19 = arith.constant 0 : index
    %c0_20 = arith.constant 0 : index
    %42 = vector.load %arg5[%c0_19, %c0_20] : memref<64x32xbf16, #tpu.memory_space<vmem>>, vector<64x32xbf16>
    %cst_21 = arith.constant dense<0.000000e+00> : vector<128x32xf32>
    %43 = tpu.matmul %41, %42, %cst_21 {dimension_numbers = #tpu.dot_dimension_numbers<[1], [0], [0], [1], [0, 0, 1, 1], [], []>} : vector<128x64xbf16>, vector<64x32xbf16>, vector<128x32xf32> -> vector<128x32xf32>
    %44 = vector.broadcast %37 : vector<128x1xf32> to vector<128x32xf32>
    %45 = arith.mulf %44, %43 : vector<128x32xf32>
    %46 = arith.truncf %45 : vector<128x32xf32> to vector<128x32xbf16>
    %c0_22 = arith.constant 0 : index
    %c0_23 = arith.constant 0 : index
    %47 = vector.load %arg8[%c0_22, %c0_23] : memref<128x32xbf16, #tpu.memory_space<vmem>>, vector<128x32xbf16>
    tpu.vector_store %arg8[%c0_22, %c0_23], %46 {strides = array<i32>} : memref<128x32xbf16, #tpu.memory_space<vmem>>, vector<128x32xbf16>,
    return
  }
  func.func @transform_0(%arg0: i32) -> (i32, i32) {
    %c0_i32 = arith.constant 0 : i32
    %c0_i32_0 = arith.constant 0 : i32
    return %arg0, %c0_i32 : i32, i32
  }
  func.func @transform_1(%arg0: i32) -> (i32, i32) {
    %c0_i32 = arith.constant 0 : i32
    %c0_i32_0 = arith.constant 0 : i32
    %c0_i32_1 = arith.constant 0 : i32
    return %c0_i32, %c0_i32_0 : i32, i32
  }
  func.func @transform_2(%arg0: i32) -> (i32, i32) {
    %c0_i32 = arith.constant 0 : i32
    %c0_i32_0 = arith.constant 0 : i32
    %c0_i32_1 = arith.constant 0 : i32
    return %c0_i32, %c0_i32_0 : i32, i32
  }
  func.func @transform_3(%arg0: i32) -> (i32, i32) {
    %c0_i32 = arith.constant 0 : i32
    %c0_i32_0 = arith.constant 0 : i32
    return %arg0, %c0_i32 : i32, i32
  }
  func.func @transform_4(%arg0: i32) -> (i32, i32) {
    %c0_i32 = arith.constant 0 : i32
    %c0_i32_0 = arith.constant 0 : i32
    %c0_i32_1 = arith.constant 0 : i32
    return %c0_i32, %c0_i32_0 : i32, i32
  }
  func.func @transform_5(%arg0: i32) -> (i32, i32) {
    %c0_i32 = arith.constant 0 : i32
    %c0_i32_0 = arith.constant 0 : i32
    return %arg0, %c0_i32 : i32, i32
  }
  func.func @transform_6(%arg0: i32) -> (i32, i32) {
    %c0_i32 = arith.constant 0 : i32
    %c0_i32_0 = arith.constant 0 : i32
    return %arg0, %c0_i32 : i32, i32
  }
  func.func @transform_7(%arg0: i32) -> (i32, i32) {
    %c0_i32 = arith.constant 0 : i32
    %c0_i32_0 = arith.constant 0 : i32
    return %arg0, %c0_i32 : i32, i32
  }
}

</mosaic_0001>

<bundles_post_ra>
// kernel: tpu_custom_call.1
= control target key start
LH: loop header
LB: loop body
LE: loop exit
PB: predicated region body
PF: predicated region fallthrough
CT: control target
= control target key end

     0   :  { %s3484_s0 = inlined_call_operand.vmem [shape: f32[256,64], index: 0, kind: input, shape index: {}]   ;;  %s3485_s1 = inlined_call_operand.vmem [shape: bf16[256,64], index: 1, kind: input, shape index: {}]   ;;  %s3486_s2 = inlined_call_operand.vmem [shape: f32[1,256], index: 2, kind: input, shape index: {}]   ;;  %s3487_s3 = inlined_call_operand.vmem [shape: bf16[256,256], index: 3, kind: input, shape index: {}]   ;;  %s3488_s4 = inlined_call_operand.vmem [shape: bf16[64,32], index: 4, kind: input, shape index: {}]   ;;  %s3489_s5 = inlined_call_operand.hbm [shape: bf16[256,256], index: 5, kind: output, shape index: {0}]   ;;  %s3490_s6 = inlined_call_operand.vmem [shape: f32[256,1], index: 6, kind: output, shape index: {1}]   ;;  %s3491_s7 = inlined_call_operand.vmem [shape: bf16[256,32], index: 7, kind: output, shape index: {2}]  }
   0x1   :  { %3492 = sst [smem:[#allocation5_spill]] %s3484_s0 }
   0x2   :  { %3493 = sst [smem:[#allocation6_spill]] %s3485_s1 }
   0x3   :  { %13 = vsyncpa [#allocation3], 0 }
   0x4   :  { %15 = vsyncpa [#allocation3 + $0x1], 0  ;;  %s2087_s24 = smov 0   ;;  %s2089_s25 = smov 0  }
   0x5   :  { %s2091_s26 = smov 0   ;;  %s2093_s27 = smov 0  }
   0x6 LB: > { %s2108_s28 = sadd.s32 4294967295, %s2042_s27   ;;  %s1742_s29 = sadd.s32 4294967294, %s2042_s27   ;;  %s2042_s27 = sphi %s2093_s27, %s3656_s27   ;;  %s2038_s26 = sphi %s2091_s26, %s3655_s26   ;;  %s2034_s25 = sphi %s2089_s25, %s3654_s25   ;;  %s2030_s24 = sphi %s2087_s24, %s3653_s24  }
   0x7   : > { %s2112_s30 = sadd.s32 1, %s2042_s27   ;;  %s143_s8 = sadd.s32 1, %s2038_s26 }
   0x8   : > { %s140_s9 = ssub.s32 %s2042_s27, %s2112_s30  ;;  %p153_p0 = scmp.ne.s32.totalorder %s2038_s26, %s2034_s25 }
   0x9   : > { %p141_p1 = scmp.eq.s32.totalorder %s140_s9, 0  ;;  %p154_p2 = scmp.eq.s32.totalorder %s2108_s28, 1 }
   0xa   : > { %p159_p3 = scmp.ne.s32.totalorder %s2034_s25, %s2030_s24  ;;  %p160_p4 = scmp.eq.s32.totalorder %s1742_s29, 1 }
   0xb   : > { %s2123_s10 = scalar_select %p141_p1, %s2038_s26, %s143_s8  }
   0xc   : > { %p2125_p5 = por %p154_p2, %p153_p0  ;;  %p2129_p6 = por %p160_p4, %p159_p3 }
   0xd   : > { %p1745_p7 = scmp.ge.s32.totalorder %s2042_s27, 1  ;;  %p258_p8 = scmp.lt.s32.totalorder %s2042_s27, 3 }
   0xf   : > { %p259_p9 = pnand %p1745_p7, %p258_p8 }
  0x10   : > { %s3496_s1 = sld [smem:[#allocation6_spill]] (!%p259_p9)  ;;  %s1747_s8 = sshll.u32 (!%p259_p9), %s2108_s28, 4 }
  0x11   : > { %262 = sbr.rel (%p259_p9) target bundleno = 479 (0x1df), region = 40  ;;  %p307_p10 = scmp.lt.s32.totalorder (!%p259_p9), %s1747_s8, 31 }
  0x12   : > { %s3497_s0 = sld [smem:[#allocation5_spill]] (!%p259_p9)  ;;  %s1756_s9 = sshll.u32 (!%p259_p9), %s2108_s28, 7 }
  0x13   : > { %s289_s13 = sand.u32 (!%p259_p9), 1, %s2034_s25   ;;  %s1606_s18 = scalar_lea.hbm (!%p259_p9), %s3489_s5, %s1756_s9 }
  0x14   : > { %s2409_s14 = sshll.u32 (!%p259_p9), %s289_s13, 7  ;;  %s1609_s19 = sshll.u32 (!%p259_p9), %s1606_s18, 4  ;;  %s1610_s19 = int_to_ptr.hbm [resolvable:$true] %s1609_s19 }
  0x15   : > { %s2454_s15 = scalar_lea.vmem (!%p259_p9), [#allocation2], %s2409_s14  ;;  %s1584_s22 = scalar_lea.sflag (!%p259_p9), [#allocation3], %s289_s13 }
  0x16   : > { %v1875_v0 = vld [vmem:[%s3496_s1 + $0x38] sm:$0xff]  ;;  %vm470_vm0 = vcmask 523264   ;;  %v1874_v4 = vld [vmem:[%s3496_s1 + $0x30] sm:$0xff]  ;;  %v1873_v8 = vld [vmem:[%s3496_s1 + $0x28] sm:$0xff]  ;;  %s3658_s8 = smov (!%p307_p10, %s1747_s8), 31  ;;  %s1607_s21 = sshll.u32 %s2454_s15, 4  ;;  %s1608_s21 = int_to_ptr.vmem [resolvable:$true] %s1607_s21 }
  0x17   : > { %v1883_v1 = vld [vmem:[%s3496_s1 + $0x78] sm:$0xff]  ;;  %v517_v2 = vsel %vm470_vm0, %v1875_v0, 0  ;;  %v1882_v5 = vld [vmem:[%s3496_s1 + $0x70] sm:$0xff]  ;;  %v514_v6 = vsel %vm470_vm0, %v1874_v4, 0  ;;  %v1881_v9 = vld [vmem:[%s3496_s1 + $0x68] sm:$0xff]  ;;  %v511_v10 = vsel %vm470_vm0, %v1873_v8, 0 }
  0x18   : > { %v2143_v3 = vsel %vm470_vm0, %v1883_v1, 0  ;;  %543 = vmatpush.bf16.xpose.msra.mxu0 %v517_v2  ;;  %1890 = vmatpush.bf16.xpose.msra.mxu3 %v517_v2  ;;  %v2154_v7 = vsel %vm470_vm0, %v1882_v5, 0  ;;  %v2165_v11 = vsel %vm470_vm0, %v1881_v9, 0  ;;  %v1872_v12 = vld [vmem:[%s3496_s1 + $0x20] sm:$0xff]  ;;  %v1871_v16 = vld [vmem:[%s3496_s1 + $0x18] sm:$0xff]  ;;  %s2189_s20 = sshll.u32 %s3658_s8, 3 }
  0x19   : > { %592 = vmatpush.bf16.xpose.msra.mxu1 %v2143_v3  ;;  %v1880_v13 = vld [vmem:[%s3496_s1 + $0x60] sm:$0xff]  ;;  %v508_v14 = vsel %vm470_vm0, %v1872_v12, 0  ;;  %v1879_v17 = vld [vmem:[%s3496_s1 + $0x58] sm:$0xff]  ;;  %v505_v18 = vsel %vm470_vm0, %v1871_v16, 0  ;;  %s2196_s23 = scalar_lea.vmem %s3497_s0, %s2189_s20  ;;  %v1870_v21 = vld [vmem:[%s3496_s1 + $0x10] sm:$0xff]  ;;  %s1994_s29 = sshra.s32 %s1610_s19, 4  ;;  %s1995_s29 = int_to_ptr.hbm [resolvable:$true] %s1994_s29 }
  0x1a   : > { %v2177_v15 = vsel %vm470_vm0, %v1880_v13, 0  ;;  %v2199_v19 = vsel %vm470_vm0, %v1879_v17, 0  ;;  %v334_v20 = vld [vmem:[%s2196_s23] sm:$0xff]  ;;  %v2208_v23 = vld [vmem:[%s2196_s23 + $0x10] sm:$0xff]  ;;  %v502_v26 = vsel %vm470_vm0, %v1870_v21, 0  ;;  %v335_v28 = vld [vmem:[%s2196_s23 + $0x8] sm:$0xff]  ;;  %p2001_p0 = scmp.lt.s32.totalorder %s1995_s29, %s3489_s5 }
  0x1b   : > { %v641_v22 = vsel %vm470_vm0, %v334_v20, 0.0  ;;  %v1878_v24 = vld [vmem:[%s3496_s1 + $0x50] sm:$0xff]  ;;  %v647_v25 = vsel %vm470_vm0, %v2208_v23, 0.0  ;;  %v1869_v29 = vld [vmem:[%s3496_s1 + $0x8] sm:$0xff]  ;;  %v644_v30 = vsel %vm470_vm0, %v335_v28, 0.0  ;;  %v337_v34 = vld [vmem:[%s2196_s23 + $0x18] sm:$0xff]  ;;  %v382_v48 = vpack.c.bf16 %v335_v28, %v334_v20 }
  0x1c   : > { %642 = vadd.xlane.f32.xlu0 %v641_v22  ;;  %648 = vadd.xlane.f32.xlu1 %v647_v25  ;;  %v2217_v27 = vsel %vm470_vm0, %v1878_v24, 0  ;;  %v1877_v31 = vld [vmem:[%s3496_s1 + $0x48] sm:$0xff]  ;;  %v499_v32 = vsel %vm470_vm0, %v1869_v29, 0  ;;  %v650_v35 = vsel %vm470_vm0, %v337_v34, 0.0  ;;  %v1868_v36 = vld [vmem:[%s3496_s1] sm:$0xff]  ;;  %v340_v40 = vld [vmem:[%s2196_s23 + $0x30] sm:$0xff]  ;;  %v383_v62 = vpack.c.bf16 %v337_v34, %v2208_v23 }
  0x1d   : > { %v2230_v33 = vsel %vm470_vm0, %v1877_v31, 0  ;;  %v338_v37 = vld [vmem:[%s2196_s23 + $0x20] sm:$0xff]  ;;  %v659_v41 = vsel %vm470_vm0, %v340_v40, 0.0  ;;  %v341_v42 = vld [vmem:[%s2196_s23 + $0x38] sm:$0xff]  ;;  %v496_v43 = vsel %vm470_vm0, %v1868_v36, 0  ;;  %v347_v47 = vld [vmem:[%s2196_s23 + $0x68] sm:$0xff]  ;;  %v1063_v22 = vlaneseq }
  0x1e   : > { %v1876_v38 = vld [vmem:[%s3496_s1 + $0x40] sm:$0xff]  ;;  %v653_v39 = vsel %vm470_vm0, %v338_v37, 0.0  ;;  %v662_v45 = vsel %vm470_vm0, %v341_v42, 0.0  ;;  %v339_v50 = vld [vmem:[%s2196_s23 + $0x28] sm:$0xff]  ;;  %v344_v51 = vld [vmem:[%s2196_s23 + $0x50] sm:$0xff]  ;;  %v680_v58 = vsel %vm470_vm0, %v347_v47, 0.0  ;;  %v385_v5 = vpack.c.bf16 %v341_v42, %v340_v40 }
  0x1f   : > { %654 = vadd.xlane.f32.xlu2 %v653_v39  ;;  %v520_v44 = vsel %vm470_vm0, %v1876_v38, 0  ;;  %v346_v46 = vld [vmem:[%s2196_s23 + $0x60] sm:$0xff]  ;;  %v343_v52 = vld [vmem:[%s2196_s23 + $0x48] sm:$0xff]  ;;  %v656_v53 = vsel %vm470_vm0, %v339_v50, 0.0  ;;  %v671_v54 = vsel %vm470_vm0, %v344_v51, 0.0  ;;  %v348_v60 = vld [vmem:[%s2196_s23 + $0x70] sm:$0xff]  ;;  %v384_v4 = vpack.c.bf16 %v339_v50, %v338_v37 }
  0x20   : > { %544 = vmatpush.bf16.xpose.msra.mxu0 %v514_v6  ;;  %1891 = vmatpush.bf16.xpose.msra.mxu3 %v514_v6  ;;  %v2252_v49 = vpack.c.bf16 %v347_v47, %v346_v46  ;;  %v668_v55 = vsel %vm470_vm0, %v343_v52, 0.0  ;;  %v342_v56 = vld [vmem:[%s2196_s23 + $0x40] sm:$0xff]  ;;  %v677_v59 = vsel %vm470_vm0, %v346_v46, 0.0  ;;  %v349_v61 = vld [vmem:[%s2196_s23 + $0x78] sm:$0xff]  ;;  %v683_v2 = vsel %vm470_vm0, %v348_v60, 0.0  ;;  %v1885_v8 = vld [vmem:[%s3488_s4 + $0x8] sm:$0xff] }
  0x21   : > { %593 = vmatpush.bf16.xpose.msra.mxu1 %v2154_v7  ;;  %v665_v57 = vsel %vm470_vm0, %v342_v56, 0.0  ;;  %v2273_v63 = vpack.c.bf16 %v349_v61, %v348_v60  ;;  %v345_v0 = vld [vmem:[%s2196_s23 + $0x58] sm:$0xff]  ;;  %v1884_v9 = vld [vmem:[%s3488_s4] sm:$0xff]  ;;  %s2328_s23 = scalar_lea.vmem %s3487_s3, %s2189_s20  ;;  %v2340_v31 = vand.u32 127, %v1063_v22  ;;  %s2000_s16 = scalar_lea.hbm %s3489_s5, 256 }
  0x22   : > { %v674_v1 = vsel %vm470_vm0, %v345_v0, 0.0  ;;  %v1887_v6 = vld [vmem:[%s3488_s4 + $0x18] sm:$0xff]  ;;  %v920_v37 = vld [vmem:[%s2328_s23 + $0x8] sm:$0xff] }
  0x23   : > { %1489 = vmatpush.bf16.msra.mxu2 %v1887_v6  ;;  %v2363_v46 = vadd.s32 128, %v2340_v31  ;;  %v937_v50 = vunpack.c.l.bf16 %v920_v37 }
  0x24   : > { %645 = vadd.xlane.f32.xlu0 %v644_v30  ;;  %651 = vadd.xlane.f32.xlu1 %v650_v35  ;;  %v2338_v30 = vshrl.u32 %v1063_v22, 7 }
  0x25   : > { %vm2392_vm11 = vcmp.ne.f32.partialorder %v937_v50, 0.0 }
  0x27   : > { %657 = vadd.xlane.f32.xlu2 %v656_v53 }
  0x28   : > { %545 = vmatpush.bf16.xpose.msra.mxu0 %v511_v10  ;;  %1892 = vmatpush.bf16.xpose.msra.mxu3 %v511_v10  ;;  %v386_v10 = vpack.c.bf16 %v343_v52, %v342_v56 }
  0x29   : > { %594 = vmatpush.bf16.xpose.msra.mxu1 %v2165_v11 }
  0x2c   : > { %660 = vadd.xlane.f32.xlu0 %v659_v41  ;;  %663 = vadd.xlane.f32.xlu1 %v662_v45 }
  0x2f   : > { %666 = vadd.xlane.f32.xlu2 %v665_v57 }
  0x30   : > { %546 = vmatpush.bf16.xpose.msra.mxu0 %v508_v14  ;;  %1893 = vmatpush.bf16.xpose.msra.mxu3 %v508_v14 }
  0x31   : > { %595 = vmatpush.bf16.xpose.msra.mxu1 %v2177_v15 }
  0x34   : > { %672 = vadd.xlane.f32.xlu1 %v671_v54  ;;  %669 = vadd.xlane.f32.xlu0 %v668_v55 }
  0x37   : > { %675 = vadd.xlane.f32.xlu2 %v674_v1 }
  0x38   : > { %547 = vmatpush.bf16.xpose.msra.mxu0 %v505_v18  ;;  %1894 = vmatpush.bf16.xpose.msra.mxu3 %v505_v18 }
  0x39   : > { %596 = vmatpush.bf16.xpose.msra.mxu1 %v2199_v19 }
  0x3c   : > { %681 = vadd.xlane.f32.xlu1 %v680_v58  ;;  %678 = vadd.xlane.f32.xlu0 %v677_v59  ;;  %v1065_v59 = vadd.s32 8, %v2338_v30 }
  0x3f   : > { %684 = vadd.xlane.f32.xlu2 %v683_v2 }
  0x40   : > { %548 = vmatpush.bf16.xpose.msra.mxu0 %v502_v26  ;;  %1895 = vmatpush.bf16.xpose.msra.mxu3 %v502_v26 }
  0x41   : > { %597 = vmatpush.bf16.xpose.msra.mxu1 %v2217_v27 }
  0x48   : > { %549 = vmatpush.bf16.xpose.msra.mxu0 %v499_v32  ;;  %1896 = vmatpush.bf16.xpose.msra.mxu3 %v499_v32 }
  0x49   : > { %598 = vmatpush.bf16.xpose.msra.mxu1 %v2230_v33 }
  0x50   : > { %550 = vmatpush.bf16.xpose.msra.mxu0 %v496_v43  ;;  %1897 = vmatpush.bf16.xpose.msra.mxu3 %v496_v43 }
  0x51   : > { %599 = vmatpush.bf16.xpose.msra.mxu1 %v520_v44 }
  0x57   : > { %1821 = vmatmul.msk.bf16.vlgmr.msra.gmra.mxu0 %vm470_vm0, %v382_v48  ;;  %1827 = vmatmul.msk.bf16.vlgmr.msra.gmra.mxu3 %vm470_vm0, %v2252_v49 }
  0x58   : > { %1898 = vmatpush.bf16.xpose.msrb.mxu3 %v2143_v3  ;;  %1829 = vmatmul.msk.bf16.vlgmr.msra.gmra.mxu1 %vm470_vm0, %v382_v48  ;;  %v686_v3 = vsel %vm470_vm0, %v349_v61, 0.0 }
  0x59   : > { %687 = vadd.xlane.f32.xlu0 %v686_v3 }
  0x60   : > { %1899 = vmatpush.bf16.xpose.msrb.mxu3 %v2154_v7  ;;  %v1886_v7 = vld [vmem:[%s3488_s4 + $0x10] sm:$0xff] }
  0x61   : > { %1490 = vmatpush.bf16.msra.mxu2 %v1886_v7 }
  0x65   : > { %1491 = vmatpush.bf16.msra.mxu2 %v1885_v8 }
  0x67   : > { %1822 = vmatmul.msk.bf16.gmra.mxu0 %vm470_vm0, %v383_v62  ;;  %1828 = vmatmul.msk.bf16.gmra.mxu3 %vm470_vm0, %v2273_v63 }
  0x68   : > { %1900 = vmatpush.bf16.xpose.msrb.mxu3 %v2165_v11  ;;  %1830 = vmatmul.msk.bf16.gmra.mxu1 %vm470_vm0, %v383_v62  ;;  %v2310_v11 = vpack.c.bf16 %v345_v0, %v344_v51  ;;  %v938_v51 = vunpack.c.h.bf16 %v920_v37 }
  0x69   : > { %1492 = vmatpush.bf16.msra.mxu2 %v1884_v9 }
  0x6a   : > { %vm2396_vm12 = vcmp.ne.f32.partialorder %v938_v51, 0.0 }
  0x6c   : > { %1853 = vmatmul.msk.bf16.vlgmr.msra.gmra.mxu2 %vm470_vm0, %v382_v48 }
  0x70   : > { %1901 = vmatpush.bf16.xpose.msrb.mxu3 %v2177_v15  ;;  %v689_v15 = vld [vmem:[%s3486_s2] sm:$0x3] }
  0x71   : > { %v2322_v16 = vperm.slane %v689_v15, 0  ;;  %v2330_v17 = vperm.slane %v689_v15, 1  ;;  %v2044_v15 = vmov 0.0  }
  0x77   : > { %1823 = vmatmul.msk.bf16.gmra.mxu0 %vm470_vm0, %v384_v4 }
  0x78   : > { %1902 = vmatpush.bf16.xpose.msrb.mxu3 %v2199_v19  ;;  %1831 = vmatmul.msk.bf16.gmra.mxu1 %vm470_vm0, %v384_v4  ;;  %v919_v19 = vld [vmem:[%s2328_s23] sm:$0xff] }
  0x79   : > { %v935_v25 = vunpack.c.l.bf16 %v919_v19 }
  0x7b   : > { %vm2349_vm1 = vcmp.ne.f32.partialorder %v935_v25, 0.0 }
  0x7c   : > { %1854 = vmatmul.msk.bf16.gmra.mxu2 %vm470_vm0, %v383_v62  ;;  %v921_v62 = vld [vmem:[%s2328_s23 + $0x10] sm:$0xff] }
  0x80   : > { %1903 = vmatpush.bf16.xpose.msrb.mxu3 %v2217_v27  ;;  %v936_v27 = vunpack.c.h.bf16 %v919_v19  ;;  %v940_v19 = vunpack.c.h.bf16 %v921_v62 }
  0x82   : > { %vm2354_vm2 = vcmp.ne.f32.partialorder %v936_v27, 0.0 }
  0x87   : > { %1824 = vmatmul.msk.bf16.gmra.mxu0 %vm470_vm0, %v385_v5 }
  0x88   : > { %1904 = vmatpush.bf16.xpose.msrb.mxu3 %v2230_v33  ;;  %1832 = vmatmul.msk.bf16.gmra.mxu1 %vm470_vm0, %v385_v5  ;;  %v2344_v33 = vstv %s1756_s9 }
  0x89   : > { %v1081_v45 = vadd.s32 %v2344_v33, %v2338_v30 }
  0x8b   : > { %vm1100_vm9 = vcmp.eq.s32.totalorder %v1081_v45, %v2340_v31  ;;  %vm1101_vm10 = vcmp.eq.s32.totalorder %v1081_v45, %v2363_v46  ;;  %v922_v45 = vld [vmem:[%s2328_s23 + $0x18] sm:$0xff] }
  0x8c   : > { %1855 = vmatmul.msk.bf16.gmra.mxu2 %vm470_vm0, %v384_v4  ;;  %v942_v2 = vunpack.c.h.bf16 %v922_v45 }
  0x8f   : > { %v643_v12 = vpop.xlane.xlu0 %642  ;;  %v649_v13 = vpop.xlane.xlu1 %648 }
  0x90   : > { %1905 = vmatpush.bf16.xpose.msrb.mxu3 %v520_v44  ;;  %v695_v21 = vadd.f32 %v2322_v16, %v643_v12  ;;  %v696_v24 = vadd.f32 %v2330_v17, %v643_v12  ;;  %v2347_v34 = vadd.f32 %v2322_v16, %v649_v13  ;;  %v2369_v53 = vadd.f32 %v2330_v17, %v649_v13 }
  0x91   : > { %v1082_v12 = vadd.s32 %v2344_v33, %v1065_v59 }
  0x92   : > { %v655_v20 = vpop.xlane.xlu2 %654 }
  0x93   : > { %v2404_v3 = vadd.f32 %v2322_v16, %v655_v20 }
  0x97   : > { %1835 = vmatmul.msk.bf16.vlgmr.msrb.gmra.mxu3 %vm470_vm0, %v2252_v49  ;;  %1825 = vmatmul.msk.bf16.gmra.mxu0 %vm470_vm0, %v386_v10  ;;  %v646_v14 = vpop.xlane.xlu0 %645  ;;  %v652_v18 = vpop.xlane.xlu1 %651 }
  0x98   : > { %1833 = vmatmul.msk.bf16.gmra.mxu1 %vm470_vm0, %v386_v10  ;;  %v697_v40 = vadd.f32 %v2322_v16, %v646_v14  ;;  %v698_v41 = vadd.f32 %v2330_v17, %v646_v14  ;;  %v2372_v54 = vadd.f32 %v2322_v16, %v652_v18  ;;  %v2383_v57 = vadd.f32 %v2330_v17, %v652_v18 }
  0x9a   : > { %v2366_v52 = vpop.xlane.xlu2 %657 }
  0x9c   : > { %1856 = vmatmul.msk.bf16.gmra.mxu2 %vm470_vm0, %v385_v5  ;;  %v2412_v5 = vadd.f32 %v2330_v17, %v655_v20 }
  0x9f   : > { %v2334_v23 = vpop.xlane.xlu0 %660  ;;  %v664_v42 = vpop.xlane.xlu1 %663 }
  0xa0   : > { %v2415_v6 = vadd.f32 %v2322_v16, %v664_v42  ;;  %v2418_v7 = vadd.f32 %v2330_v17, %v664_v42  ;;  %v2424_v9 = vadd.f32 %v2322_v16, %v2334_v23 }
  0xa7   : > { %1836 = vmatmul.msk.bf16.gmra.mxu3 %vm470_vm0, %v2273_v63  ;;  %1826 = vmatmul.msk.bf16.gmra.mxu0 %vm470_vm0, %v2310_v11  ;;  %v2374_v55 = vpop.xlane.xlu0 %669  ;;  %v673_v25 = vpop.xlane.xlu1 %672 }
  0xa8   : > { %1834 = vmatmul.msk.bf16.gmra.mxu1 %vm470_vm0, %v2310_v11  ;;  %v2492_v50 = vadd.f32 %v2322_v16, %v2374_v55  ;;  %v2496_v51 = vadd.f32 %v2330_v17, %v2374_v55 }
  0xac   : > { %1857 = vmatmul.msk.bf16.gmra.mxu2 %vm470_vm0, %v386_v10  ;;  %v939_v10 = vunpack.c.l.bf16 %v921_v62  ;;  %v941_v62 = vunpack.c.l.bf16 %v922_v45 }
  0xbc   : > { %1858 = vmatmul.msk.bf16.gmra.mxu2 %vm470_vm0, %v2310_v11 }
  0xcc   : > { %1859 = vmatmul.msk.bf16.gmra.mxu2 %vm470_vm0, %v2252_v49 }
  0xd4   : > { %v552_v26 = vpop.f32.mrf.mxu0 }
  0xd5   : > { %v727_v28 = vsub.f32 %v695_v21, %v552_v26  ;;  %v601_v29 = vpop.f32.mrf.mxu1 }
  0xd6   : > { %v728_v32 = vsub.f32 %v696_v24, %v601_v29  ;;  %v2433_v24 = vadd.f32 %v2330_v17, %v2334_v23  ;;  %v1066_v23 = vadd.s32 16, %v2338_v30 }
  0xd7   : > { %v759_v35 = vmax.f32 %v727_v28, 1.0 }
  0xd8   : > { %v760_v38 = vmax.f32 %v728_v32, 1.0 }
  0xd9   : > { %v791_v43 = vmul.f32 0.1, %v759_v35  ;;  %v855_v44 = vmul.f32 0.5, %v759_v35  ;;  %v667_v35 = vpop.xlane.xlu2 %666 }
  0xda   : > { %v792_v47 = vmul.f32 0.1, %v760_v38  ;;  %v856_v48 = vmul.f32 0.5, %v760_v38  ;;  %v2435_v28 = vpop.f32.mrf.mxu3 }
  0xdb   : > { %vm823_vm3 = vcmp.gt.f32.partialorder %v552_v26, %v791_v43  ;;  %vm887_vm4 = vcmp.gt.f32.partialorder %v552_v26, %v855_v44  ;;  %v2478_v43 = vadd.f32 %v2330_v17, %v2366_v52  ;;  %v2481_v44 = vadd.f32 %v2322_v16, %v673_v25 }
  0xdc   : > { %vm2378_vm5 = vmand %vm823_vm3, %vm2349_vm1  ;;  %vm824_vm6 = vcmp.gt.f32.partialorder %v601_v29, %v792_v47  ;;  %vm888_vm7 = vcmp.gt.f32.partialorder %v601_v29, %v856_v48  ;;  %v554_v58 = vpop.f32.mrf.mxu0  ;;  %v2488_v48 = vadd.f32 %v2330_v17, %v673_v25  ;;  %v2554_v29 = vadd.f32 %v2330_v17, %v667_v35  ;;  %1860 = vmatmul.msk.bf16.gmra.mxu2 %vm470_vm0, %v2273_v63 }
  0xdd   : > { %vm1000_vm8 = vmand %vm824_vm6, %vm2354_vm2  ;;  %v729_v60 = vsub.f32 %v697_v40, %v554_v58  ;;  %v603_v61 = vpop.f32.mrf.mxu1 }
  0xde   : > { %v730_v1 = vsub.f32 %v698_v41, %v603_v61  ;;  %vm1031_vm13 = vmor %vm887_vm4, %vm2378_vm5  ;;  %v679_v41 = vpop.xlane.xlu0 %678 }
  0xdf   : > { %v761_v4 = vmax.f32 %v729_v60, 1.0  ;;  %vm1032_vm14 = vmor %vm888_vm7, %vm1000_vm8  ;;  %vm1102_vm7 = vcmp.eq.s32.totalorder %v1082_v12, %v2340_v31  ;;  %v719_v56 = vadd.f32 %v2322_v16, %v679_v41 }
  0xe0   : > { %v762_v8 = vmax.f32 %v730_v1, 1.0  ;;  %vm1132_vm15 = vmor %vm1031_vm13, %vm1100_vm9  ;;  %vm2459_vm9 = vcmp.ne.f32.partialorder %v939_v10, 0.0  ;;  %v925_v10 = vld [vmem:[%s2328_s23 + $0x30] sm:$0xff] }
  0xe1   : > { %v793_v13 = vmul.f32 0.1, %v761_v4  ;;  %v857_v14 = vmul.f32 0.5, %v761_v4  ;;  %vm1133_vm1 = vmor %vm1032_vm14, %vm1101_vm10  ;;  %v1164_v18 = vsel %vm1132_vm15, 1.0, %v2044_v15  ;;  %vm2463_vm10 = vcmp.ne.f32.partialorder %v940_v19, 0.0 }
  0xe2   : > { %v794_v20 = vmul.f32 0.1, %v762_v8  ;;  %v858_v21 = vmul.f32 0.5, %v762_v8  ;;  %v1165_v22 = vsel %vm1133_vm1, 1.0, %v2044_v15  ;;  %v2539_v25 = vpop.f32.mrf.mxu3 }
  0xe3   : > { %vm825_vm2 = vcmp.gt.f32.partialorder %v554_v58, %v793_v13  ;;  %vm889_vm3 = vcmp.gt.f32.partialorder %v554_v58, %v857_v14  ;;  %v1196_v26 = vadd.f32 %v1165_v22, %v1164_v18  ;;  %v1404_v27 = vpack.c.bf16 %v1165_v22, %v1164_v18  ;;  %v923_v22 = vld [vmem:[%s2328_s23 + $0x20] sm:$0xff] }
  0xe4   : > { %vm2439_vm4 = vmand %vm825_vm2, %vm2392_vm11  ;;  %vm826_vm5 = vcmp.gt.f32.partialorder %v603_v61, %v794_v20  ;;  %vm890_vm6 = vcmp.gt.f32.partialorder %v603_v61, %v858_v21  ;;  %v2443_v32 = vpop.f32.mrf.mxu0  ;;  %vm1103_vm11 = vcmp.eq.s32.totalorder %v1082_v12, %v2363_v46  ;;  %v1067_v58 = vadd.s32 24, %v2338_v30  ;;  %v682_v12 = vpop.xlane.xlu1 %681 }
  0xe5   : > { %vm2449_vm8 = vmand %vm826_vm5, %vm2396_vm12  ;;  %1197 = vadd.xlane.f32.xlu1 %v1196_v26  ;;  %1420 = vst [vmem:[%s2454_s15] sm:$0xff] %v1404_v27  ;;  %v731_v37 = vsub.f32 %v2347_v34, %v2443_v32  ;;  %v606_v39 = vpop.f32.mrf.mxu1  ;;  %v2474_v34 = vadd.f32 %v2322_v16, %v2366_v52  ;;  %v751_v13 = vsub.f32 %v719_v56, %v2435_v28  ;;  %v943_v40 = vunpack.c.l.bf16 %v923_v22 }
  0xe6   : > { %v732_v42 = vsub.f32 %v2369_v53, %v606_v39  ;;  %vm1033_vm12 = vmor %vm889_vm3, %vm2439_vm4  ;;  %v1083_v53 = vadd.s32 %v2344_v33, %v1066_v23  ;;  %v2521_v14 = vadd.s32 %v2344_v33, %v1067_v58  ;;  %v2563_v36 = vadd.f32 %v2330_v17, %v682_v12  ;;  %v2577_v58 = vld [vmem:[%s2328_s23 + $0x68] sm:$0xff] }
  0xe7   : > { %v763_v47 = vmax.f32 %v731_v37, 1.0  ;;  %vm1034_vm13 = vmor %vm890_vm6, %vm2449_vm8  ;;  %v676_v37 = vpop.xlane.xlu2 %675 }
  0xe8   : > { %v764_v52 = vmax.f32 %v732_v42, 1.0  ;;  %vm1134_vm14 = vmor %vm1033_vm12, %vm1102_vm7  ;;  %vm2532_vm7 = vcmp.ne.f32.partialorder %v941_v62, 0.0  ;;  %vm1104_vm8 = vcmp.eq.s32.totalorder %v1083_v53, %v2340_v31 }
  0xe9   : > { %v795_v59 = vmul.f32 0.1, %v763_v47  ;;  %v859_v60 = vmul.f32 0.5, %v763_v47  ;;  %vm1135_vm15 = vmor %vm1034_vm13, %vm1103_vm11  ;;  %v1166_v61 = vsel %vm1134_vm14, 1.0, %v2044_v15  ;;  %vm1106_vm14 = vcmp.eq.s32.totalorder %v2521_v14, %v2340_v31 }
  0xea   : > { %v796_v55 = vmul.f32 0.1, %v764_v52  ;;  %v860_v0 = vmul.f32 0.5, %v764_v52  ;;  %v1167_v1 = vsel %vm1135_vm15, 1.0, %v2044_v15  ;;  %v944_v47 = vunpack.c.h.bf16 %v923_v22 }
  0xeb   : > { %vm827_vm1 = vcmp.gt.f32.partialorder %v2443_v32, %v795_v59  ;;  %vm891_vm2 = vcmp.gt.f32.partialorder %v2443_v32, %v859_v60  ;;  %v1199_v4 = vadd.f32 %v1167_v1, %v1166_v61  ;;  %v1405_v8 = vpack.c.bf16 %v1167_v1, %v1166_v61 }
  0xec   : > { %vm2513_vm3 = vmand %vm827_vm1, %vm2459_vm9  ;;  %vm828_vm4 = vcmp.gt.f32.partialorder %v606_v39, %v796_v55  ;;  %vm892_vm5 = vcmp.gt.f32.partialorder %v606_v39, %v860_v0  ;;  %v2517_v11 = vpop.f32.mrf.mxu0  ;;  %vm1105_vm9 = vcmp.eq.s32.totalorder %v1083_v53, %v2363_v46  ;;  %v2566_v32 = vadd.f32 %v2330_v17, %v679_v41  ;;  %v2593_v0 = vld [vmem:[%s2328_s23 + $0x60] sm:$0xff] }
  0xed   : > { %vm2525_vm6 = vmand %vm828_vm4, %vm2463_vm10  ;;  %1200 = vadd.xlane.f32.xlu2 %v1199_v4  ;;  %1421 = vst [vmem:[%s2454_s15 + $0x8] sm:$0xff] %v1405_v8  ;;  %v733_v19 = vsub.f32 %v2372_v54, %v2517_v11  ;;  %v608_v21 = vpop.f32.mrf.mxu1  ;;  %vm2542_vm10 = vcmp.ne.f32.partialorder %v942_v2, 0.0  ;;  %v2551_v54 = vadd.f32 %v2322_v16, %v667_v35  ;;  %v783_v35 = vmax.f32 %v751_v13, 1.0  ;;  %v924_v13 = vld [vmem:[%s2328_s23 + $0x28] sm:$0xff] }
  0xee   : > { %v734_v26 = vsub.f32 %v2383_v57, %v608_v21  ;;  %vm1035_vm11 = vmor %vm891_vm2, %vm2513_vm3  ;;  %v2560_v57 = vadd.f32 %v2322_v16, %v682_v12  ;;  %v1068_v59 = vadd.s32 32, %v2338_v30  ;;  %v961_v12 = vunpack.c.l.bf16 %v2577_v58 }
  0xef   : > { %v765_v23 = vmax.f32 %v733_v19, 1.0  ;;  %vm1036_vm12 = vmor %vm892_vm5, %vm2525_vm6  ;;  %v2588_v62 = vmul.f32 0.1, %v783_v35  ;;  %vm1107_vm6 = vcmp.eq.s32.totalorder %v2521_v14, %v2363_v46  ;;  %v2613_v18 = vmul.f32 0.5, %v783_v35  ;;  %v688_v14 = vpop.xlane.xlu0 %687 }
  0xf0   : > { %v766_v38 = vmax.f32 %v734_v26, 1.0  ;;  %vm1136_vm13 = vmor %vm1035_vm11, %vm1104_vm8  ;;  %v753_v20 = vsub.f32 %v2560_v57, %v2539_v25  ;;  %v2629_v26 = vadd.f32 %v2330_v17, %v676_v37  ;;  %v1085_v27 = vadd.s32 %v2344_v33, %v1068_v59 }
  0xf1   : > { %v797_v39 = vmul.f32 0.1, %v765_v23  ;;  %v861_v42 = vmul.f32 0.5, %v765_v23  ;;  %vm1137_vm15 = vmor %vm1036_vm12, %vm1105_vm9  ;;  %v1168_v45 = vsel %vm1136_vm13, 1.0, %v2044_v15  ;;  %vm2607_vm9 = vcmp.ne.f32.partialorder %v944_v47, 0.0 }
  0xf2   : > { %v798_v41 = vmul.f32 0.1, %v766_v38  ;;  %v862_v52 = vmul.f32 0.5, %v766_v38  ;;  %v1169_v56 = vsel %vm1137_vm15, 1.0, %v2044_v15  ;;  %v959_v23 = vunpack.c.l.bf16 %v2593_v0 }
  0xf3   : > { %vm829_vm1 = vcmp.gt.f32.partialorder %v2517_v11, %v797_v39  ;;  %vm893_vm2 = vcmp.gt.f32.partialorder %v2517_v11, %v861_v42  ;;  %v1202_v60 = vadd.f32 %v1169_v56, %v1168_v45  ;;  %v1406_v53 = vpack.c.bf16 %v1169_v56, %v1168_v45 }
  0xf4   : > { %vm2584_vm3 = vmand %vm829_vm1, %vm2532_vm7  ;;  %vm830_vm4 = vcmp.gt.f32.partialorder %v608_v21, %v798_v41  ;;  %vm894_vm5 = vcmp.gt.f32.partialorder %v608_v21, %v862_v52  ;;  %v562_v55 = vpop.f32.mrf.mxu0  ;;  %vm2603_vm7 = vcmp.ne.f32.partialorder %v943_v40, 0.0  ;;  %v945_v11 = vunpack.c.l.bf16 %v924_v13  ;;  %v685_v40 = vpop.xlane.xlu2 %684 }
  0xf5   : > { %vm2597_vm8 = vmand %vm830_vm4, %vm2542_vm10  ;;  %1203 = vadd.xlane.f32.xlu0 %v1202_v60  ;;  %1422 = vst [vmem:[%s2454_s15 + $0x10] sm:$0xff] %v1406_v53  ;;  %v735_v2 = vsub.f32 %v2404_v3, %v562_v55  ;;  %v611_v8 = vpop.f32.mrf.mxu1  ;;  %v2623_v3 = vadd.f32 %v2322_v16, %v676_v37  ;;  %v946_v38 = vunpack.c.h.bf16 %v924_v13  ;;  %vm847_vm13 = vcmp.gt.f32.partialorder %v2435_v28, %v2588_v62 }
  0xf6   : > { %v736_v19 = vsub.f32 %v2412_v5, %v611_v8  ;;  %vm1037_vm10 = vmor %vm893_vm2, %vm2584_vm3  ;;  %v2631_v5 = vpop.f32.mrf.mxu3  ;;  %v1069_v39 = vadd.s32 40, %v2338_v30  ;;  %v785_v47 = vmax.f32 %v753_v20, 1.0  ;;  %v723_v60 = vadd.f32 %v2322_v16, %v685_v40 }
  0xf7   : > { %v767_v22 = vmax.f32 %v735_v2, 1.0  ;;  %vm1038_vm11 = vmor %vm894_vm5, %vm2597_vm8  ;;  %vm1108_vm5 = vcmp.eq.s32.totalorder %v1085_v27, %v2340_v31  ;;  %vm2664_vm8 = vcmp.ne.f32.partialorder %v945_v11, 0.0  ;;  %v725_v20 = vadd.f32 %v2322_v16, %v688_v14 }
  0xf8   : > { %v768_v57 = vmax.f32 %v736_v19, 1.0  ;;  %vm1138_vm12 = vmor %vm1037_vm10, %vm1106_vm14  ;;  %vm1109_vm10 = vcmp.eq.s32.totalorder %v1085_v27, %v2363_v46  ;;  %v2674_v13 = vmul.f32 0.1, %v785_v47  ;;  %v2690_v11 = vadd.f32 %v2330_v17, %v688_v14 }
  0xf9   : > { %v799_v21 = vmul.f32 0.1, %v767_v22  ;;  %v863_v35 = vmul.f32 0.5, %v767_v22  ;;  %vm1139_vm15 = vmor %vm1038_vm11, %vm1107_vm6  ;;  %v1170_v37 = vsel %vm1138_vm12, 1.0, %v2044_v15  ;;  %v2684_v22 = vmul.f32 0.5, %v785_v47 }
  0xfa   : > { %v800_v42 = vmul.f32 0.1, %v768_v57  ;;  %v864_v45 = vmul.f32 0.5, %v768_v57  ;;  %v1171_v41 = vsel %vm1139_vm15, 1.0, %v2044_v15  ;;  %v755_v16 = vsub.f32 %v723_v60, %v2631_v5  ;;  %v926_v60 = vld [vmem:[%s2328_s23 + $0x38] sm:$0xff] }
  0xfb   : > { %vm831_vm14 = vcmp.gt.f32.partialorder %v562_v55, %v799_v21  ;;  %vm895_vm1 = vcmp.gt.f32.partialorder %v562_v55, %v863_v35  ;;  %v1205_v52 = vadd.f32 %v1171_v41, %v1170_v37  ;;  %v1407_v56 = vpack.c.bf16 %v1171_v41, %v1170_v37 }
  0xfc   : > { %vm2650_vm2 = vmand %vm831_vm14, %vm2603_vm7  ;;  %vm832_vm3 = vcmp.gt.f32.partialorder %v611_v8, %v800_v42  ;;  %vm896_vm4 = vcmp.gt.f32.partialorder %v611_v8, %v864_v45  ;;  %v564_v49 = vpop.f32.mrf.mxu0  ;;  %vm2668_vm7 = vcmp.ne.f32.partialorder %v946_v38, 0.0  ;;  %v1086_v55 = vadd.s32 %v2344_v33, %v1069_v39 }
  0xfd   : > { %vm2658_vm6 = vmand %vm832_vm3, %vm2607_vm9  ;;  %1206 = vadd.xlane.f32.xlu1 %v1205_v52  ;;  %1423 = vst [vmem:[%s2454_s15 + $0x18] sm:$0xff] %v1407_v56  ;;  %v737_v61 = vsub.f32 %v2474_v34, %v564_v49  ;;  %v613_v2 = vpop.f32.mrf.mxu1  ;;  %v2681_v34 = vadd.f32 %v2330_v17, %v685_v40  ;;  %v947_v21 = vunpack.c.l.bf16 %v925_v10  ;;  %vm2699_vm15 = vcmp.ne.f32.partialorder %v959_v23, 0.0  ;;  %v928_v56 = vld [vmem:[%s2328_s23 + $0x48] sm:$0xff] }
  0xfe   : > { %v738_v19 = vsub.f32 %v2478_v43, %v613_v2  ;;  %vm1039_vm9 = vmor %vm895_vm1, %vm2650_vm2  ;;  %v2693_v43 = vld [vmem:[%s2328_s23 + $0x78] sm:$0xff]  ;;  %v948_v40 = vunpack.c.h.bf16 %v925_v10  ;;  %v2706_v39 = vpop.f32.mrf.mxu3  ;;  %v1076_v53 = vadd.s32 96, %v2338_v30 }
  0xff   : > { %v769_v57 = vmax.f32 %v737_v61, 1.0  ;;  %vm1040_vm11 = vmor %vm896_vm4, %vm2658_vm6  ;;  %v965_v23 = vunpack.c.l.bf16 %v2693_v43  ;;  %v757_v59 = vsub.f32 %v725_v20, %v2706_v39  ;;  %v787_v61 = vmax.f32 %v755_v16, 1.0 }
 0x100   : > { %v770_v38 = vmax.f32 %v738_v19, 1.0  ;;  %vm1140_vm12 = vmor %vm1039_vm9, %vm1108_vm5  ;;  %v1070_v19 = vadd.s32 48, %v2338_v30  ;;  %vm1111_vm9 = vcmp.eq.s32.totalorder %v1086_v55, %v2363_v46  ;;  %v949_v16 = vunpack.c.l.bf16 %v926_v60 }
 0x101   : > { %v801_v8 = vmul.f32 0.1, %v769_v57  ;;  %v865_v37 = vmul.f32 0.5, %v769_v57  ;;  %vm1141_vm14 = vmor %vm1040_vm11, %vm1109_vm10  ;;  %v1172_v17 = vsel %vm1140_vm12, 1.0, %v2044_v15  ;;  %vm2738_vm10 = vcmp.ne.f32.partialorder %v947_v21, 0.0 }
 0x102   : > { %v802_v42 = vmul.f32 0.1, %v770_v38  ;;  %v866_v45 = vmul.f32 0.5, %v770_v38  ;;  %v1173_v47 = vsel %vm1141_vm14, 1.0, %v2044_v15  ;;  %vm2715_vm3 = vmand %vm847_vm13, %vm2699_vm15  ;;  %v1071_v57 = vadd.s32 56, %v2338_v30 }
 0x103   : > { %vm833_vm1 = vcmp.gt.f32.partialorder %v564_v49, %v801_v8  ;;  %vm897_vm2 = vcmp.gt.f32.partialorder %v564_v49, %v865_v37  ;;  %v1208_v41 = vadd.f32 %v1173_v47, %v1172_v17  ;;  %v1408_v52 = vpack.c.bf16 %v1173_v47, %v1172_v17 }
 0x104   : > { %vm2721_vm4 = vmand %vm833_vm1, %vm2664_vm8  ;;  %vm834_vm5 = vcmp.gt.f32.partialorder %v613_v2, %v802_v42  ;;  %vm898_vm6 = vcmp.gt.f32.partialorder %v613_v2, %v866_v45  ;;  %v567_v14 = vpop.f32.mrf.mxu0  ;;  %vm1110_vm8 = vcmp.eq.s32.totalorder %v1086_v55, %v2340_v31  ;;  %vm2748_vm11 = vcmp.ne.f32.partialorder %v948_v40, 0.0 }
 0x105   : > { %vm2730_vm13 = vmand %vm834_vm5, %vm2668_vm7  ;;  %1209 = vadd.xlane.f32.xlu2 %v1208_v41  ;;  %1424 = vst [vmem:[%s2454_s15 + $0x20] sm:$0xff] %v1408_v52  ;;  %v739_v1 = vsub.f32 %v2424_v9, %v567_v14  ;;  %v616_v10 = vpop.f32.mrf.mxu1  ;;  %vm911_vm15 = vcmp.gt.f32.partialorder %v2435_v28, %v2613_v18  ;;  %v789_v49 = vmax.f32 %v757_v59, 1.0  ;;  %v950_v21 = vunpack.c.h.bf16 %v926_v60 }
 0x106   : > { %v740_v4 = vsub.f32 %v2433_v24, %v616_v10  ;;  %vm1041_vm7 = vmor %vm897_vm2, %vm2721_vm4  ;;  %v2758_v55 = vadd.s32 %v2344_v33, %v1076_v53  ;;  %v1087_v17 = vadd.s32 %v2344_v33, %v1070_v19  ;;  %v2766_v45 = vadd.s32 %v2344_v33, %v1071_v57 }
 0x107   : > { %v771_v9 = vmax.f32 %v739_v1, 1.0  ;;  %vm1042_vm12 = vmor %vm898_vm6, %vm2730_vm13  ;;  %v2777_v52 = vmul.f32 0.1, %v787_v61  ;;  %v2785_v59 = vmul.f32 0.1, %v789_v49  ;;  %v2787_v60 = vmul.f32 0.5, %v787_v61 }
 0x108   : > { %v772_v24 = vmax.f32 %v740_v4, 1.0  ;;  %vm1142_vm14 = vmor %vm1041_vm7, %vm1110_vm8  ;;  %vm2797_vm8 = vcmp.ne.f32.partialorder %v949_v16, 0.0  ;;  %v927_v1 = vld [vmem:[%s2328_s23 + $0x40] sm:$0xff]  ;;  %v2822_v20 = vmul.f32 0.5, %v789_v49  ;;  %v1072_v4 = vadd.s32 64, %v2338_v30 }
 0x109   : > { %v803_v35 = vmul.f32 0.1, %v771_v9  ;;  %v867_v8 = vmul.f32 0.5, %v771_v9  ;;  %vm1143_vm1 = vmor %vm1042_vm12, %vm1111_vm9  ;;  %v1174_v37 = vsel %vm1142_vm14, 1.0, %v2044_v15  ;;  %vm2807_vm9 = vcmp.ne.f32.partialorder %v961_v12, 0.0 }
 0x10a   : > { %v804_v2 = vmul.f32 0.1, %v772_v24  ;;  %v868_v40 = vmul.f32 0.5, %v772_v24  ;;  %v1175_v42 = vsel %vm1143_vm1, 1.0, %v2044_v15  ;;  %vm2773_vm5 = vmor %vm911_vm15, %vm2715_vm3  ;;  %vm1124_vm12 = vcmp.eq.s32.totalorder %v2758_v55, %v2340_v31 }
 0x10b   : > { %vm835_vm2 = vcmp.gt.f32.partialorder %v567_v14, %v803_v35  ;;  %vm899_vm4 = vcmp.gt.f32.partialorder %v567_v14, %v867_v8  ;;  %v1211_v47 = vadd.f32 %v1175_v42, %v1174_v37  ;;  %v1409_v41 = vpack.c.bf16 %v1175_v42, %v1174_v37 }
 0x10c   : > { %vm2781_vm0 = vmand %vm835_vm2, %vm2738_vm10  ;;  %vm836_vm6 = vcmp.gt.f32.partialorder %v616_v10, %v804_v2  ;;  %vm900_vm13 = vcmp.gt.f32.partialorder %v616_v10, %v868_v40  ;;  %v569_v27 = vpop.f32.mrf.mxu0  ;;  %vm1112_vm10 = vcmp.eq.s32.totalorder %v1087_v17, %v2340_v31  ;;  %vm1113_vm14 = vcmp.eq.s32.totalorder %v1087_v17, %v2363_v46 }
 0x10d   : > { %vm2791_vm3 = vmand %vm836_vm6, %vm2748_vm11  ;;  %1212 = vadd.xlane.f32.xlu0 %v1211_v47  ;;  %1425 = vst [vmem:[%s2454_s15 + $0x28] sm:$0xff] %v1409_v41  ;;  %v741_v18 = vsub.f32 %v2415_v6, %v569_v27  ;;  %v618_v62 = vpop.f32.mrf.mxu1  ;;  %vm2812_vm11 = vcmp.ne.f32.partialorder %v950_v21, 0.0  ;;  %vm2826_vm1 = vcmp.ne.f32.partialorder %v965_v23, 0.0  ;;  %vm1114_vm2 = vcmp.eq.s32.totalorder %v2766_v45, %v2340_v31  ;;  %v2985_v41 = vld [vmem:[%s2328_s23 + $0x50] sm:$0xff] }
 0x10e   : > { %v742_v19 = vsub.f32 %v2418_v7, %v618_v62  ;;  %vm1043_vm15 = vmor %vm899_vm4, %vm2781_vm0  ;;  %vm853_vm0 = vcmp.gt.f32.partialorder %v2706_v39, %v2785_v59  ;;  %v960_v57 = vunpack.c.h.bf16 %v2593_v0  ;;  %v951_v23 = vunpack.c.l.bf16 %v927_v1 }
 0x10f   : > { %v773_v7 = vmax.f32 %v741_v18, 1.0  ;;  %vm1044_vm4 = vmor %vm900_vm13, %vm2791_vm3  ;;  %v952_v16 = vunpack.c.h.bf16 %v927_v1  ;;  %vm1115_vm13 = vcmp.eq.s32.totalorder %v2766_v45, %v2363_v46  ;;  %v2863_v8 = vadd.s32 %v2344_v33, %v1072_v4 }
 0x110   : > { %v774_v14 = vmax.f32 %v742_v19, 1.0  ;;  %vm1144_vm6 = vmor %vm1043_vm15, %vm1112_vm10  ;;  %v1079_v53 = vadd.s32 120, %v2338_v30  ;;  %v962_v19 = vunpack.c.h.bf16 %v2577_v58  ;;  %v1073_v6 = vadd.s32 72, %v2338_v30 }
 0x111   : > { %v805_v9 = vmul.f32 0.1, %v773_v7  ;;  %v869_v38 = vmul.f32 0.5, %v773_v7  ;;  %vm1145_vm7 = vmor %vm1044_vm4, %vm1113_vm14  ;;  %v2844_v24 = vsel %vm1144_vm6, 1.0, %v2044_v15  ;;  %vm2875_vm14 = vcmp.ne.f32.partialorder %v960_v57, 0.0 }
 0x112   : > { %v806_v10 = vmul.f32 0.1, %v774_v14  ;;  %v870_v49 = vmul.f32 0.5, %v774_v14  ;;  %vm2853_vm3 = vmor %vm2773_vm5, %vm1124_vm12  ;;  %v2858_v21 = vsel %vm1145_vm7, 1.0, %v2044_v15  ;;  %vm2891_vm6 = vcmp.ne.f32.partialorder %v952_v16, 0.0 }
 0x113   : > { %vm837_vm10 = vcmp.gt.f32.partialorder %v569_v27, %v805_v9  ;;  %vm901_vm15 = vcmp.gt.f32.partialorder %v569_v27, %v869_v38  ;;  %v1410_v37 = vpack.c.bf16 %v2858_v21, %v2844_v24  ;;  %v2899_v28 = vsel %vm2853_vm3, 1.0, %v2044_v15 }
 0x114   : > { %vm2869_vm5 = vmand %vm837_vm10, %vm2797_vm8  ;;  %vm838_vm7 = vcmp.gt.f32.partialorder %v618_v62, %v806_v10  ;;  %vm902_vm12 = vcmp.gt.f32.partialorder %v618_v62, %v870_v49  ;;  %v2879_v42 = vpop.f32.mrf.mxu0  ;;  %vm2885_vm8 = vcmp.ne.f32.partialorder %v951_v23, 0.0  ;;  %vm1125_vm10 = vcmp.eq.s32.totalorder %v2758_v55, %v2363_v46 }
 0x115   : > { %vm1014_vm4 = vmand %vm838_vm7, %vm2812_vm11  ;;  %v743_v47 = vsub.f32 %v2551_v54, %v2879_v42  ;;  %v2889_v63 = vpop.f32.mrf.mxu1  ;;  %1426 = vst [vmem:[%s2454_s15 + $0x30] sm:$0xff] %v1410_v37  ;;  %v953_v27 = vunpack.c.l.bf16 %v928_v56  ;;  %vm917_vm3 = vcmp.gt.f32.partialorder %v2706_v39, %v2822_v20  ;;  %v954_v23 = vunpack.c.h.bf16 %v928_v56 }
 0x116   : > { %v744_v54 = vsub.f32 %v2554_v29, %v2889_v63  ;;  %vm1045_vm11 = vmor %vm901_vm15, %vm2869_vm5  ;;  %v1077_v38 = vadd.s32 104, %v2338_v30  ;;  %v2958_v16 = vadd.s32 %v2344_v33, %v1073_v6  ;;  %v2988_v56 = vadd.s32 %v2344_v33, %v1079_v53  ;;  %v933_v53 = vld [vmem:[%s2328_s23 + $0x70] sm:$0xff] }
 0x117   : > { %v775_v1 = vmax.f32 %v743_v47, 1.0  ;;  %vm1046_vm7 = vmor %vm902_vm12, %vm1014_vm4  ;;  %vm3576_vm12 = vcmp.gt.f32.partialorder %v2539_v25, %v2674_v13  ;;  %v3633_v45 = vmov 0 }
 0x118   : > { %v776_v4 = vmax.f32 %v744_v54, 1.0  ;;  %vm1146_vm15 = vmor %vm1045_vm11, %vm1114_vm2 }
 0x119   : > { %vm2925_vm4 = vmand %vm3576_vm12, %vm2807_vm9  ;;  %v807_v62 = vmul.f32 0.1, %v775_v1  ;;  %v871_v14 = vmul.f32 0.5, %v775_v1  ;;  %v1178_v57 = vsel %vm1146_vm15, 1.0, %v2044_v15  ;;  %vm1117_vm15 = vcmp.eq.s32.totalorder %v2863_v8, %v2363_v46 }
 0x11a   : > { %v2860_v35 = vpop.f32.mrf.mxu3  ;;  %vm1147_vm2 = vmor %vm1046_vm7, %vm1115_vm13  ;;  %v808_v61 = vmul.f32 0.1, %v776_v4  ;;  %v872_v9 = vmul.f32 0.5, %v776_v4 }
 0x11b   : > { %v752_v2 = vsub.f32 %v2566_v32, %v2860_v35  ;;  %vm2940_vm9 = vmand %vm853_vm0, %vm2826_vm1  ;;  %vm839_vm1 = vcmp.gt.f32.partialorder %v2879_v42, %v807_v62  ;;  %v1179_v59 = vsel %vm1147_vm2, 1.0, %v2044_v15  ;;  %vm903_vm12 = vcmp.gt.f32.partialorder %v2879_v42, %v871_v14 }
 0x11c   : > { %vm2962_vm0 = vmand %vm839_vm1, %vm2885_vm8  ;;  %v1217_v49 = vadd.f32 %v1179_v59, %v1178_v57  ;;  %v1411_v0 = vpack.c.bf16 %v1179_v59, %v1178_v57  ;;  %v2967_v37 = vpop.f32.mrf.mxu0  ;;  %vm904_vm8 = vcmp.gt.f32.partialorder %v2889_v63, %v872_v9  ;;  %v956_v42 = vunpack.c.h.bf16 %v2985_v41 }
 0x11d   : > { %v784_v18 = vmax.f32 %v752_v2, 1.0  ;;  %v745_v40 = vsub.f32 %v2492_v50, %v2967_v37  ;;  %v2982_v47 = vpop.f32.mrf.mxu1 }
 0x11e   : > { %1218 = vadd.xlane.f32.xlu2 %v1217_v49  ;;  %1427 = vst [vmem:[%s2454_s15 + $0x38] sm:$0xff] %v1411_v0 }
 0x11f   : > { %v816_v29 = vmul.f32 0.1, %v784_v18  ;;  %v880_v7 = vmul.f32 0.5, %v784_v18  ;;  %v777_v54 = vmax.f32 %v745_v40, 1.0 }
 0x121   : > { %vm848_vm11 = vcmp.gt.f32.partialorder %v2860_v35, %v816_v29  ;;  %vm912_vm13 = vcmp.gt.f32.partialorder %v2860_v35, %v880_v7  ;;  %v964_v35 = vunpack.c.h.bf16 %v933_v53  ;;  %v955_v29 = vunpack.c.l.bf16 %v2985_v41 }
 0x122   : > { %vm2949_vm7 = vmand %vm848_vm11, %vm2875_vm14  ;;  %v2955_v12 = vpop.f32.mrf.mxu3  ;;  %vm840_vm14 = vcmp.gt.f32.partialorder %v2889_v63, %v808_v61  ;;  %vm2998_vm11 = vcmp.ne.f32.partialorder %v954_v23, 0.0  ;;  %v809_v7 = vmul.f32 0.1, %v777_v54  ;;  %v873_v4 = vmul.f32 0.5, %v777_v54 }
 0x123   : > { %vm2974_vm2 = vmand %vm840_vm14, %vm2891_vm6  ;;  %v754_v2 = vsub.f32 %v2563_v36, %v2955_v12  ;;  %vm2992_vm6 = vcmp.ne.f32.partialorder %v953_v27, 0.0  ;;  %v746_v36 = vsub.f32 %v2496_v51, %v2982_v47  ;;  %v3013_v51 = vadd.s32 %v2344_v33, %v1077_v38 }
 0x124   : > { %vm1056_vm1 = vmor %vm912_vm13, %vm2949_vm7  ;;  %vm3023_vm7 = vcmp.ne.f32.partialorder %v962_v19, 0.0  ;;  %v1074_v27 = vadd.s32 80, %v2338_v30  ;;  %v963_v61 = vunpack.c.l.bf16 %v933_v53  ;;  %v3050_v38 = vpop.f32.mrf.mxu0  ;;  %v966_v41 = vunpack.c.h.bf16 %v2693_v43 }
 0x125   : > { %v786_v18 = vmax.f32 %v754_v2, 1.0  ;;  %vm1157_vm14 = vmor %vm1056_vm1, %vm1125_vm10  ;;  %v778_v1 = vmax.f32 %v746_v36, 1.0  ;;  %v1214_v43 = vadd.f32 %v2858_v21, %v2844_v24 }
 0x126   : > { %v1189_v6 = vsel %vm1157_vm14, 1.0, %v2044_v15  ;;  %vm1047_vm13 = vmor %vm903_vm12, %vm2962_vm0  ;;  %vm3593_vm0 = vcmp.eq.s32.totalorder %v2863_v8, %v2340_v31  ;;  %vm841_vm14 = vcmp.gt.f32.partialorder %v2967_v37, %v809_v7  ;;  %v1091_v32 = vadd.s32 %v2344_v33, %v1074_v27 }
 0x127   : > { %vm1048_vm1 = vmor %vm904_vm8, %vm2974_vm2  ;;  %v810_v62 = vmul.f32 0.1, %v778_v1  ;;  %v874_v14 = vmul.f32 0.5, %v778_v1  ;;  %v1232_v57 = vadd.f32 %v1189_v6, %v2899_v28  ;;  %v1416_v19 = vpack.c.bf16 %v1189_v6, %v2899_v28 }
 0x128   : > { %vm1148_vm12 = vmor %vm1047_vm13, %vm3593_vm0  ;;  %v818_v23 = vmul.f32 0.1, %v786_v18  ;;  %vm905_vm2 = vcmp.gt.f32.partialorder %v2967_v37, %v873_v4 }
 0x129   : > { %vm1149_vm8 = vmor %vm1048_vm1, %vm1117_vm15  ;;  %vm842_vm10 = vcmp.gt.f32.partialorder %v2982_v47, %v810_v62  ;;  %vm906_vm5 = vcmp.gt.f32.partialorder %v2982_v47, %v874_v14  ;;  %1233 = vadd.xlane.f32.xlu1 %v1232_v57  ;;  %1432 = vst [vmem:[%s2454_s15 + $0x60] sm:$0xff] %v1416_v19  ;;  %v1180_v28 = vsel %vm1148_vm12, 1.0, %v2044_v15  ;;  %vm3596_vm1 = vcmp.gt.f32.partialorder %v2539_v25, %v2684_v22  ;;  %v3084_v22 = vpop.f32.mrf.mxu1 }
 0x12a   : > { %v3043_v63 = vpop.f32.mrf.mxu3  ;;  %v1181_v9 = vsel %vm1149_vm8, 1.0, %v2044_v15  ;;  %vm3057_vm15 = vmor %vm917_vm3, %vm2940_vm9  ;;  %v747_v25 = vsub.f32 %v2481_v44, %v3050_v38  ;;  %vm3094_vm9 = vcmp.ne.f32.partialorder %v955_v29, 0.0  ;;  %v882_v44 = vmul.f32 0.5, %v786_v18 }
 0x12b   : > { %vm3068_vm0 = vmor %vm3596_vm1, %vm2925_vm4  ;;  %v1220_v20 = vadd.f32 %v1181_v9, %v1180_v28  ;;  %v1412_v13 = vpack.c.bf16 %v1181_v9, %v1180_v28  ;;  %v756_v58 = vsub.f32 %v2681_v34, %v3043_v63  ;;  %v748_v34 = vsub.f32 %v2488_v48, %v3084_v22  ;;  %v930_v48 = vld [vmem:[%s2328_s23 + $0x58] sm:$0xff]  ;;  %s1996_s23 = scalar_lea.hbm %s1995_s29, 128 }
 0x12c   : > { %vm3076_vm3 = vmand %vm841_vm14, %vm2992_vm6  ;;  %vm1119_vm6 = vcmp.eq.s32.totalorder %v2958_v16, %v2363_v46  ;;  %v779_v17 = vmax.f32 %v747_v25, 1.0  ;;  %vm3128_vm12 = vcmp.ne.f32.partialorder %v963_v61, 0.0  ;;  %vm850_vm13 = vcmp.gt.f32.partialorder %v2955_v12, %v818_v23  ;;  %p1997_p11 = scmp.ne.s32.totalorder %s1995_s29, %s1996_s23  ;;  %p2002_p1 = scmp.lt.s32.totalorder %s2000_s16, %s1996_s23 }
 0x12d   : > { %vm3090_vm4 = vmand %vm842_vm10, %vm2998_vm11  ;;  %1221 = vadd.xlane.f32.xlu0 %v1220_v20  ;;  %1428 = vst [vmem:[%s2454_s15 + $0x40] sm:$0xff] %v1412_v13  ;;  %v3105_v49 = vmax.f32 %v756_v58, 1.0  ;;  %vm3107_vm11 = vcmp.ne.f32.partialorder %v964_v35, 0.0  ;;  %vm3111_vm10 = vcmp.ne.f32.partialorder %v956_v42, 0.0  ;;  %v780_v40 = vmax.f32 %v748_v34, 1.0 }
 0x12e   : > { %vm1049_vm14 = vmor %vm905_vm2, %vm3076_vm3  ;;  %v811_v37 = vmul.f32 0.1, %v779_v17  ;;  %v875_v50 = vmul.f32 0.5, %v779_v17  ;;  %vm3611_vm2 = vcmp.eq.s32.totalorder %v2958_v16, %v2340_v31  ;;  %v957_v54 = vunpack.c.l.bf16 %v930_v48  ;;  %p1998_p12 = pnand %p1997_p11, %p2125_p5  ;;  %p2003_p2 = por %p2002_p1, %p2001_p0 }
 0x12f   : > { %vm1050_vm8 = vmor %vm906_vm5, %vm3090_vm4  ;;  %v812_v47 = vmul.f32 0.1, %v780_v40  ;;  %v876_v18 = vmul.f32 0.5, %v780_v40  ;;  %vm914_vm4 = vcmp.gt.f32.partialorder %v2955_v12, %v882_v44  ;;  %v820_v1 = vmul.f32 0.1, %v3105_v49 }
 0x130   : > { %vm1150_vm5 = vmor %vm1049_vm14, %vm3611_vm2  ;;  %vm843_vm1 = vcmp.gt.f32.partialorder %v3050_v38, %v811_v37  ;;  %v958_v21 = vunpack.c.h.bf16 %v930_v48  ;;  %vm3612_vm14 = vcmp.gt.f32.partialorder %v2631_v5, %v2777_v52  ;;  %v579_v52 = vpop.f32.mrf.mxu0  ;;  %v1078_v57 = vadd.s32 112, %v2338_v30  ;;  %p1999_p13 = pneg %p1998_p12 }
 0x131   : > { %vm1151_vm3 = vmor %vm1050_vm8, %vm1119_vm6  ;;  %v1182_v53 = vsel %vm1150_vm5, 1.0, %v2044_v15  ;;  %vm907_vm8 = vcmp.gt.f32.partialorder %v3050_v38, %v875_v50  ;;  %vm844_vm5 = vcmp.gt.f32.partialorder %v3084_v22, %v812_v47  ;;  %1215 = vadd.xlane.f32.xlu1 %v1214_v43  ;;  %v749_v7 = vsub.f32 %v2623_v3, %v579_v52  ;;  %v628_v4 = vpop.f32.mrf.mxu1 }
 0x132   : > { %v638_v24 = vpop.f32.mrf.mxu3  ;;  %vm3150_vm2 = vmand %vm3612_vm14, %vm3128_vm12  ;;  %v1183_v29 = vsel %vm1151_vm3, 1.0, %v2044_v15  ;;  %v750_v14 = vsub.f32 %v2629_v26, %v628_v4  ;;  %vm3184_vm3 = vcmp.ne.f32.partialorder %v966_v41, 0.0  ;;  %v3624_v26 = vmov 0  ;;  %v3300_v41 = vpop.f32.mrf.mxu2  ;;  %p2004_p3 = pnand %p2003_p2, %p1999_p13 }
 0x133   : > { %vm3158_vm6 = vmand %vm850_vm13, %vm3023_vm7  ;;  %v758_v35 = vsub.f32 %v2690_v11, %v638_v24  ;;  %vm908_vm7 = vcmp.gt.f32.partialorder %v3084_v22, %v876_v18  ;;  %v1223_v42 = vadd.f32 %v1183_v29, %v1182_v53  ;;  %v1413_v27 = vpack.c.bf16 %v1183_v29, %v1182_v53 }
 0x134   : > { %vm3168_vm12 = vmand %vm843_vm1, %vm3094_vm9  ;;  %v781_v19 = vmax.f32 %v749_v7, 1.0  ;;  %v3626_v23 = vmov 0  ;;  %v3629_v61 = vmov 0  ;;  %v782_v38 = vmax.f32 %v750_v14, 1.0 }
 0x135   : > { %vm3176_vm13 = vmand %vm844_vm5, %vm3111_vm10  ;;  %v790_v62 = vmax.f32 %v758_v35, 1.0  ;;  %1429 = vst [vmem:[%s2454_s15 + $0x48] sm:$0xff] %v1413_v27  ;;  %vm3623_vm5 = vcmp.eq.s32.totalorder %v2988_v56, %v2340_v31  ;;  %v1075_v12 = vadd.s32 88, %v2338_v30  ;;  %v1095_v17 = vadd.s32 %v2344_v33, %v1078_v57 }
 0x136   : > { %vm1051_vm10 = vmor %vm907_vm8, %vm3168_vm12  ;;  %vm3628_vm8 = vcmp.eq.s32.totalorder %v3013_v51, %v2340_v31  ;;  %v813_v8 = vmul.f32 0.1, %v781_v19  ;;  %v877_v39 = vmul.f32 0.5, %v781_v19  ;;  %v814_v30 = vmul.f32 0.1, %v782_v38 }
 0x137   : > { %vm3199_vm9 = vmor %vm3057_vm15, %vm3623_vm5  ;;  %v822_v28 = vmul.f32 0.1, %v790_v62  ;;  %v886_v9 = vmul.f32 0.5, %v790_v62  ;;  %v878_v58 = vmul.f32 0.5, %v782_v38  ;;  %v1092_v0 = vadd.s32 %v2344_v33, %v1075_v12 }
 0x138   : > { %v3625_v26 = vsel %vm3199_vm9, 4294967295, %v3624_v26  ;;  %vm3207_vm1 = vmor %vm914_vm4, %vm3158_vm6  ;;  %vm3225_vm4 = vcmp.ne.f32.partialorder %v957_v54, 0.0  ;;  %vm3635_vm6 = vcmp.eq.s32.totalorder %v1091_v32, %v2340_v31 }
 0x139   : > { %v3627_v23 = vsel %vm3207_vm1, 4294967295, %v3626_v23  ;;  %vm3216_vm12 = vmor %vm3068_vm0, %vm3628_vm8  ;;  %vm3229_vm0 = vcmp.ne.f32.partialorder %v958_v21, 0.0  ;;  %vm3636_vm8 = vcmp.gt.f32.partialorder %v3043_v63, %v820_v1  ;;  %vm918_vm14 = vcmp.gt.f32.partialorder %v638_v24, %v886_v9  ;;  %1224 = vadd.xlane.f32.xlu1 %v1223_v42 }
 0x13a   : > { %v3630_v61 = vsel %vm3216_vm12, 4294967295, %v3629_v61  ;;  %vm1052_vm15 = vmor %vm908_vm7, %vm3176_vm13  ;;  %v3634_v45 = vsel %vm3229_vm0, 4294967295, %v3633_v45  ;;  %vm854_vm13 = vcmp.gt.f32.partialorder %v638_v24, %v822_v28  ;;  %vm3639_vm12 = vcmp.eq.s32.totalorder %v1091_v32, %v2363_v46  ;;  %v3321_v53 = vpop.f32.mrf.mxu2 }
 0x13b   : > { %vm1152_vm5 = vmor %vm1051_vm10, %vm3635_vm6  ;;  %vm845_vm0 = vcmp.gt.f32.partialorder %v579_v52, %v813_v8  ;;  %vm909_vm10 = vcmp.gt.f32.partialorder %v579_v52, %v877_v39 }
 0x13c   : > { %vm3239_vm7 = vmand %vm3636_vm8, %vm3107_vm11  ;;  %v1184_v25 = vsel %vm1152_vm5, 1.0, %v2044_v15  ;;  %vm3640_vm11 = vcmp.gt.f32.partialorder %v2631_v5, %v2787_v60  ;;  %v884_v5 = vmul.f32 0.5, %v3105_v49  ;;  %vm1127_vm8 = vcmp.eq.s32.totalorder %v3013_v51, %v2363_v46 }
 0x13d   : > { %vm1153_vm1 = vmor %vm1052_vm15, %vm3639_vm12  ;;  %vm910_vm15 = vcmp.gt.f32.partialorder %v628_v4, %v878_v58 }
 0x13e   : > { %vm1030_vm9 = vmand %vm854_vm13, %vm3184_vm3  ;;  %v1185_v22 = vsel %vm1153_vm1, 1.0, %v2044_v15  ;;  %vm846_vm3 = vcmp.gt.f32.partialorder %v628_v4, %v814_v30 }
 0x13f   : > { %vm3254_vm6 = vmor %vm3640_vm11, %vm3150_vm2  ;;  %v1226_v34 = vadd.f32 %v1185_v22, %v1184_v25  ;;  %v1414_v44 = vpack.c.bf16 %v1185_v22, %v1184_v25  ;;  %vm916_vm11 = vcmp.gt.f32.partialorder %v3043_v63, %v884_v5 }
 0x140   : > { %vm3258_vm12 = vmor %vm918_vm14, %vm1030_vm9  ;;  %vm1131_vm9 = vcmp.eq.s32.totalorder %v2988_v56, %v2363_v46  ;;  %vm3647_vm14 = vnez %v3634_v45 }
 0x141   : > { %vm1021_vm1 = vmand %vm845_vm0, %vm3225_vm4  ;;  %1227 = vadd.xlane.f32.xlu2 %v1226_v34  ;;  %1430 = vst [vmem:[%s2454_s15 + $0x50] sm:$0xff] %v1414_v44  ;;  %vm1122_vm0 = vcmp.eq.s32.totalorder %v1092_v0, %v2340_v31 }
 0x142   : > { %vm3266_vm2 = vmor %vm909_vm10, %vm1021_vm1  ;;  %vm1123_vm10 = vcmp.eq.s32.totalorder %v1092_v0, %v2363_v46  ;;  %vm3651_vm1 = vnez %v3627_v23 }
 0x143   : > { %vm1022_vm5 = vmand %vm846_vm3, %vm3647_vm14  ;;  %vm3650_vm3 = vnez %v3625_v26  ;;  %vm3652_vm14 = vnez %v3630_v61 }
 0x144   : > { %vm3278_vm4 = vmor %vm910_vm15, %vm1022_vm5  ;;  %v1194_v56 = vsel %vm3650_vm3, 1.0, %v2044_v15  ;;  %v1190_v51 = vsel %vm3652_vm14, 1.0, %v2044_v15 }
 0x145   : > { %vm1163_vm13 = vmor %vm3258_vm12, %vm1131_vm9  ;;  %vm1128_vm9 = vcmp.eq.s32.totalorder %v1095_v17, %v2340_v31  ;;  %v3328_v31 = vpop.f32.mrf.mxu2 }
 0x146   : > { %v1195_v33 = vsel %vm1163_vm13, 1.0, %v2044_v15  ;;  %vm1159_vm15 = vmor %vm3651_vm1, %vm1127_vm8  ;;  %vm1129_vm8 = vcmp.eq.s32.totalorder %v1095_v17, %v2363_v46 }
 0x147   : > { %v1241_v49 = vadd.f32 %v1195_v33, %v1194_v56  ;;  %v1419_v48 = vpack.c.bf16 %v1195_v33, %v1194_v56  ;;  %v1191_v40 = vsel %vm1159_vm15, 1.0, %v2044_v15  ;;  %vm1154_vm12 = vmor %vm3266_vm2, %vm1122_vm0 }
 0x148   : > { %v1235_v32 = vadd.f32 %v1191_v40, %v1190_v51  ;;  %v1417_v36 = vpack.c.bf16 %v1191_v40, %v1190_v51  ;;  %vm1155_vm5 = vmor %vm3278_vm4, %vm1123_vm10  ;;  %v1186_v37 = vsel %vm1154_vm12, 1.0, %v2044_v15 }
 0x149   : > { %1242 = vadd.xlane.f32.xlu1 %v1241_v49  ;;  %1435 = vst [vmem:[%s2454_s15 + $0x78] sm:$0xff] %v1419_v48  ;;  %v1187_v50 = vsel %vm1155_vm5, 1.0, %v2044_v15  ;;  %vm1060_vm2 = vmor %vm916_vm11, %vm3239_vm7 }
 0x14a   : > { %1236 = vadd.xlane.f32.xlu2 %v1235_v32  ;;  %1433 = vst [vmem:[%s2454_s15 + $0x68] sm:$0xff] %v1417_v36  ;;  %v1229_v43 = vadd.f32 %v1187_v50, %v1186_v37  ;;  %v1415_v47 = vpack.c.bf16 %v1187_v50, %v1186_v37  ;;  %vm1160_vm4 = vmor %vm3254_vm6, %vm1128_vm9 }
 0x14b   : > { %vm1161_vm0 = vmor %vm1060_vm2, %vm1129_vm8  ;;  %v1192_v46 = vsel %vm1160_vm4, 1.0, %v2044_v15 }
 0x14c   : > { %1230 = vadd.xlane.f32.xlu0 %v1229_v43  ;;  %1431 = vst [vmem:[%s2454_s15 + $0x58] sm:$0xff] %v1415_v47  ;;  %v1193_v63 = vsel %vm1161_vm0, 1.0, %v2044_v15 }
 0x14d   : > { %v1238_v18 = vadd.f32 %v1193_v63, %v1192_v46  ;;  %v1418_v54 = vpack.c.bf16 %v1193_v63, %v1192_v46 }
 0x14f   : > { %1434 = vst [vmem:[%s2454_s15 + $0x70] sm:$0xff] %v1418_v54 }
 0x154   : > { %1239 = vadd.xlane.f32.xlu0 %v1238_v18 }
 0x155   : > { %2007 = shalt.err (!%p2004_p3)
}
 0x156   : > { %s2045_s13 = smov 128   ;;  %s2046_s15 = smov 8   ;;  %vm1436_vm7 = vcmask 7168   ;;  %v3349_v15 = vpop.f32.mrf.mxu2  ;;  %vm1566_vm11 = vcmask 257024  }
 0x157   : > { %1906 = dma.vmem_to_hbm [thread:$0]  (%p2125_p5), %s1608_s21, 2048, %s1610_s19, %s1584_s22, %s2045_s13, %s2045_s13, %s2046_s15  }
 0x158   : > { %s3347_s1 = scalar_lea.vmem %s3490_s6, %s2189_s20  ;;  %v1198_v1 = vpop.xlane.xlu1 %1197  ;;  %s1755_s0 = sshll.u32 %s3658_s8, 2 }
 0x159   : > { %1948 = vrsqrt.f32 %v1198_v1  ;;  %1437 = vst.msk [vmem:[%s3347_s1] sm:$0xff] %vm1436_vm7, %v1198_v1  ;;  %vm1250_vm13 = vweird.f32 %v1198_v1  ;;  %s3366_s19 = scalar_lea.vmem %s3491_s7, %s1755_s0 }
 0x15e   : > { %v3353_v21 = vpop.f32.mrf.mxu2 }
 0x15f   : > { %v1949_v24 = vpop.eup %1948 }
 0x160   : > { %v1245_v6 = vmul.f32 %v1949_v24, %v1198_v1  ;;  %v1201_v16 = vpop.xlane.xlu2 %1200  ;;  %vm1251_vm6 = vweird.f32 %v1949_v24 }
 0x161   : > { %1950 = vrsqrt.f32 %v1201_v16  ;;  %1438 = vst.msk [vmem:[%s3347_s1 + $0x8] sm:$0xff] %vm1436_vm7, %v1201_v16  ;;  %vm1252_vm10 = vmor %vm1250_vm13, %vm1251_vm6  ;;  %vm1260_vm1 = vweird.f32 %v1201_v16 }
 0x162   : > { %v1246_v35 = vmul.f32 %v1949_v24, %v1245_v6 }
 0x164   : > { %v1247_v52 = vmul.f32 0.5, %v1246_v35 }
 0x166   : > { %v1248_v29 = vsub.f32 1.5, %v1247_v52  ;;  %v3357_v7 = vpop.f32.mrf.mxu2 }
 0x167   : > { %v1951_v55 = vpop.eup %1950 }
 0x168   : > { %v1249_v4 = vmul.f32 %v1949_v24, %v1248_v29  ;;  %v1255_v42 = vmul.f32 %v1951_v55, %v1201_v16  ;;  %v1204_v27 = vpop.xlane.xlu0 %1203  ;;  %vm1261_vm3 = vweird.f32 %v1951_v55 }
 0x169   : > { %1952 = vrsqrt.f32 %v1204_v27  ;;  %1439 = vst.msk [vmem:[%s3347_s1 + $0x10] sm:$0xff] %vm1436_vm7, %v1204_v27  ;;  %vm1262_vm15 = vmor %vm1260_vm1, %vm1261_vm3  ;;  %vm1270_vm12 = vweird.f32 %v1204_v27 }
 0x16a   : > { %v1253_v11 = vsel %vm1252_vm10, %v1949_v24, %v1249_v4  ;;  %v1256_v62 = vmul.f32 %v1951_v55, %v1255_v42 }
 0x16b   : > { %v1534_v14 = vmul.f32 %v3300_v41, %v1253_v11 }
 0x16c   : > { %v1257_v57 = vmul.f32 0.5, %v1256_v62 }
 0x16d   : > { %v1550_v3 = vpack.c.bf16 %v1534_v14, %v1534_v14 }
 0x16e   : > { %v1258_v19 = vsub.f32 1.5, %v1257_v57  ;;  %v3370_v23 = vpop.f32.mrf.mxu2 }
 0x16f   : > { %v1953_v26 = vpop.eup %1952  ;;  %1567 = vst.msk [vmem:[%s3366_s19] sm:$0xf] %vm1566_vm11, %v1550_v3 }
 0x170   : > { %v1259_v61 = vmul.f32 %v1951_v55, %v1258_v19  ;;  %v1265_v28 = vmul.f32 %v1953_v26, %v1204_v27  ;;  %v1207_v9 = vpop.xlane.xlu1 %1206  ;;  %vm1271_vm14 = vweird.f32 %v1953_v26 }
 0x171   : > { %1954 = vrsqrt.f32 %v1207_v9  ;;  %1440 = vst.msk [vmem:[%s3347_s1 + $0x18] sm:$0xff] %vm1436_vm7, %v1207_v9  ;;  %vm1272_vm9 = vmor %vm1270_vm12, %vm1271_vm14  ;;  %vm1280_vm8 = vweird.f32 %v1207_v9 }
 0x172   : > { %v1263_v38 = vsel %vm1262_vm15, %v1951_v55, %v1259_v61  ;;  %v1266_v12 = vmul.f32 %v1953_v26, %v1265_v28 }
 0x173   : > { %v1535_v8 = vmul.f32 %v3321_v53, %v1263_v38 }
 0x174   : > { %v1267_v39 = vmul.f32 0.5, %v1266_v12 }
 0x175   : > { %v1551_v20 = vpack.c.bf16 %v1535_v8, %v1535_v8 }
 0x176   : > { %v1268_v45 = vsub.f32 1.5, %v1267_v39  ;;  %v3377_v30 = vpop.f32.mrf.mxu2 }
 0x177   : > { %v1955_v13 = vpop.eup %1954  ;;  %1568 = vst.msk [vmem:[%s3366_s19 + $0x4] sm:$0xf] %vm1566_vm11, %v1551_v20 }
 0x178   : > { %v1269_v58 = vmul.f32 %v1953_v26, %v1268_v45  ;;  %v1275_v25 = vmul.f32 %v1955_v13, %v1207_v9  ;;  %v1210_v22 = vpop.xlane.xlu2 %1209  ;;  %vm1281_vm5 = vweird.f32 %v1955_v13 }
 0x179   : > { %1956 = vrsqrt.f32 %v1210_v22  ;;  %1441 = vst.msk [vmem:[%s3347_s1 + $0x20] sm:$0xff] %vm1436_vm7, %v1210_v22  ;;  %vm1282_vm2 = vmor %vm1280_vm8, %vm1281_vm5  ;;  %vm1290_vm0 = vweird.f32 %v1210_v22 }
 0x17a   : > { %v1273_v59 = vsel %vm1272_vm9, %v1953_v26, %v1269_v58  ;;  %v1276_v10 = vmul.f32 %v1955_v13, %v1275_v25 }
 0x17b   : > { %v1536_v34 = vmul.f32 %v3328_v31, %v1273_v59 }
 0x17c   : > { %v1277_v44 = vmul.f32 0.5, %v1276_v10 }
 0x17d   : > { %v1552_v0 = vpack.c.bf16 %v1536_v34, %v1536_v34 }
 0x17e   : > { %v1278_v5 = vsub.f32 1.5, %v1277_v44  ;;  %v3384_v17 = vpop.f32.mrf.mxu2 }
 0x17f   : > { %v1957_v60 = vpop.eup %1956  ;;  %1569 = vst.msk [vmem:[%s3366_s19 + $0x8] sm:$0xf] %vm1566_vm11, %v1552_v0 }
 0x180   : > { %v1279_v2 = vmul.f32 %v1955_v13, %v1278_v5  ;;  %v1285_v56 = vmul.f32 %v1957_v60, %v1210_v22  ;;  %v1213_v33 = vpop.xlane.xlu0 %1212  ;;  %vm1291_vm4 = vweird.f32 %v1957_v60 }
 0x181   : > { %1958 = vrsqrt.f32 %v1213_v33  ;;  %1442 = vst.msk [vmem:[%s3347_s1 + $0x28] sm:$0xff] %vm1436_vm7, %v1213_v33  ;;  %vm1292_vm6 = vmor %vm1290_vm0, %vm1291_vm4  ;;  %vm1300_vm10 = vweird.f32 %v1213_v33 }
 0x182   : > { %v1283_v51 = vsel %vm1282_vm2, %v1955_v13, %v1279_v2  ;;  %v1286_v49 = vmul.f32 %v1957_v60, %v1285_v56 }
 0x183   : > { %v1537_v48 = vmul.f32 %v3349_v15, %v1283_v51 }
 0x184   : > { %v1287_v40 = vmul.f32 0.5, %v1286_v49 }
 0x185   : > { %v1553_v41 = vpack.c.bf16 %v1537_v48, %v1537_v48 }
 0x186   : > { %v1288_v32 = vsub.f32 1.5, %v1287_v40  ;;  %v3391_v43 = vpop.f32.mrf.mxu2 }
 0x187   : > { %v1959_v36 = vpop.eup %1958  ;;  %1570 = vst.msk [vmem:[%s3366_s19 + $0xc] sm:$0xf] %vm1566_vm11, %v1553_v41 }
 0x188   : > { %v1289_v37 = vmul.f32 %v1957_v60, %v1288_v32  ;;  %v1295_v50 = vmul.f32 %v1959_v36, %v1213_v33  ;;  %vm1301_vm13 = vweird.f32 %v1959_v36 }
 0x189   : > { %vm1302_vm3 = vmor %vm1300_vm10, %vm1301_vm13 }
 0x18a   : > { %v1293_v47 = vsel %vm1292_vm6, %v1957_v60, %v1289_v37  ;;  %v1296_v46 = vmul.f32 %v1959_v36, %v1295_v50 }
 0x18b   : > { %v1538_v63 = vmul.f32 %v3353_v21, %v1293_v47 }
 0x18c   : > { %v1297_v18 = vmul.f32 0.5, %v1296_v46 }
 0x18d   : > { %v1554_v54 = vpack.c.bf16 %v1538_v63, %v1538_v63 }
 0x18e   : > { %v1298_v53 = vsub.f32 1.5, %v1297_v18  ;;  %v3396_v1 = vpop.f32.mrf.mxu2 }
 0x18f   : > { %1571 = vst.msk [vmem:[%s3366_s19 + $0x10] sm:$0xf] %vm1566_vm11, %v1554_v54 }
 0x190   : > { %v1299_v31 = vmul.f32 %v1959_v36, %v1298_v53 }
 0x191   : > { %v1219_v15 = vpop.xlane.xlu2 %1218 }
 0x192   : > { %v1303_v24 = vsel %vm1302_vm3, %v1959_v36, %v1299_v31  ;;  %1960 = vrsqrt.f32 %v1219_v15  ;;  %1444 = vst.msk [vmem:[%s3347_s1 + $0x38] sm:$0xff] %vm1436_vm7, %v1219_v15  ;;  %vm1320_vm15 = vweird.f32 %v1219_v15 }
 0x193   : > { %v1539_v21 = vmul.f32 %v3357_v7, %v1303_v24 }
 0x195   : > { %v1555_v6 = vpack.c.bf16 %v1539_v21, %v1539_v21 }
 0x196   : > { %v3405_v29 = vpop.f32.mrf.mxu2 }
 0x197   : > { %1572 = vst.msk [vmem:[%s3366_s19 + $0x14] sm:$0xf] %vm1566_vm11, %v1555_v6 }
 0x198   : > { %v1961_v35 = vpop.eup %1960 }
 0x199   : > { %v1315_v52 = vmul.f32 %v1961_v35, %v1219_v15  ;;  %vm1321_vm1 = vweird.f32 %v1961_v35 }
 0x19a   : > { %vm1322_vm14 = vmor %vm1320_vm15, %vm1321_vm1 }
 0x19b   : > { %v1316_v4 = vmul.f32 %v1961_v35, %v1315_v52 }
 0x19c   : > { %v1234_v16 = vpop.xlane.xlu1 %1233 }
 0x19d   : > { %1962 = vrsqrt.f32 %v1234_v16  ;;  %1449 = vst.msk [vmem:[%s3347_s1 + $0x60] sm:$0xff] %vm1436_vm7, %v1234_v16  ;;  %v1317_v42 = vmul.f32 0.5, %v1316_v4  ;;  %vm1370_vm9 = vweird.f32 %v1234_v16 }
 0x19e   : > { %v1524_v28 = vpop.f32.mrf.mxu2 }
 0x19f   : > { %v1318_v7 = vsub.f32 1.5, %v1317_v42 }
 0x1a0   : > { %v1222_v55 = vpop.xlane.xlu0 %1221 }
 0x1a1   : > { %1964 = vrsqrt.f32 %v1222_v55  ;;  %1445 = vst.msk [vmem:[%s3347_s1 + $0x40] sm:$0xff] %vm1436_vm7, %v1222_v55  ;;  %v1319_v57 = vmul.f32 %v1961_v35, %v1318_v7  ;;  %vm1330_vm2 = vweird.f32 %v1222_v55 }
 0x1a3   : > { %v1963_v27 = vpop.eup %1962  ;;  %v1323_v26 = vsel %vm1322_vm14, %v1961_v35, %v1319_v57 }
 0x1a4   : > { %v1365_v11 = vmul.f32 %v1963_v27, %v1234_v16  ;;  %v1216_v62 = vpop.xlane.xlu1 %1215  ;;  %v1541_v9 = vmul.f32 %v3377_v30, %v1323_v26  ;;  %vm1371_vm12 = vweird.f32 %v1963_v27 }
 0x1a5   : > { %1966 = vrsqrt.f32 %v1216_v62  ;;  %1443 = vst.msk [vmem:[%s3347_s1 + $0x30] sm:$0xff] %vm1436_vm7, %v1216_v62  ;;  %vm1372_vm8 = vmor %vm1370_vm9, %vm1371_vm12  ;;  %vm1310_vm6 = vweird.f32 %v1216_v62 }
 0x1a6   : > { %v1366_v3 = vmul.f32 %v1963_v27, %v1365_v11  ;;  %v1557_v39 = vpack.c.bf16 %v1541_v9, %v1541_v9  ;;  %v3419_v56 = vpop.f32.mrf.mxu2 }
 0x1a7   : > { %v1965_v14 = vpop.eup %1964 }
 0x1a8   : > { %v1325_v19 = vmul.f32 %v1965_v14, %v1222_v55  ;;  %v1367_v61 = vmul.f32 0.5, %v1366_v3  ;;  %1574 = vst.msk [vmem:[%s3366_s19 + $0x1c] sm:$0xf] %vm1566_vm11, %v1557_v39  ;;  %vm1331_vm5 = vweird.f32 %v1965_v14 }
 0x1a9   : > { %vm1332_vm4 = vmor %vm1330_vm2, %vm1331_vm5 }
 0x1aa   : > { %v1326_v38 = vmul.f32 %v1965_v14, %v1325_v19  ;;  %v1368_v12 = vsub.f32 1.5, %v1367_v61 }
 0x1ab   : > { %v1967_v8 = vpop.eup %1966 }
 0x1ac   : > { %v1327_v20 = vmul.f32 0.5, %v1326_v38  ;;  %v1305_v45 = vmul.f32 %v1967_v8, %v1216_v62  ;;  %v1225_v13 = vpop.xlane.xlu1 %1224  ;;  %v1369_v58 = vmul.f32 %v1963_v27, %v1368_v12  ;;  %vm1311_vm0 = vweird.f32 %v1967_v8 }
 0x1ad   : > { %1968 = vrsqrt.f32 %v1225_v13  ;;  %1446 = vst.msk [vmem:[%s3347_s1 + $0x48] sm:$0xff] %vm1436_vm7, %v1225_v13  ;;  %vm1312_vm13 = vmor %vm1310_vm6, %vm1311_vm0  ;;  %vm1340_vm3 = vweird.f32 %v1225_v13 }
 0x1ae   : > { %v1328_v25 = vsub.f32 1.5, %v1327_v20  ;;  %v1306_v22 = vmul.f32 %v1967_v8, %v1305_v45  ;;  %v1373_v59 = vsel %vm1372_vm8, %v1963_v27, %v1369_v58  ;;  %v3442_v15 = vpop.f32.mrf.mxu2 }
 0x1af   : > { %v1546_v34 = vmul.f32 %v1524_v28, %v1373_v59 }
 0x1b0   : > { %v1329_v10 = vmul.f32 %v1965_v14, %v1328_v25  ;;  %v1307_v44 = vmul.f32 0.5, %v1306_v22 }
 0x1b1   : > { %v1562_v5 = vpack.c.bf16 %v1546_v34, %v1546_v34 }
 0x1b2   : > { %v1333_v0 = vsel %vm1332_vm4, %v1965_v14, %v1329_v10  ;;  %v1308_v2 = vsub.f32 1.5, %v1307_v44 }
 0x1b3   : > { %v1542_v60 = vmul.f32 %v3384_v17, %v1333_v0  ;;  %v1969_v33 = vpop.eup %1968  ;;  %1579 = vst.msk [vmem:[%s3366_s19 + $0x30] sm:$0xf] %vm1566_vm11, %v1562_v5 }
 0x1b4   : > { %v1228_v30 = vpop.xlane.xlu2 %1227  ;;  %v1309_v49 = vmul.f32 %v1967_v8, %v1308_v2  ;;  %v1335_v48 = vmul.f32 %v1969_v33, %v1225_v13  ;;  %vm1341_vm10 = vweird.f32 %v1969_v33 }
 0x1b5   : > { %1970 = vrsqrt.f32 %v1228_v30  ;;  %1447 = vst.msk [vmem:[%s3347_s1 + $0x50] sm:$0xff] %vm1436_vm7, %v1228_v30  ;;  %v1558_v51 = vpack.c.bf16 %v1542_v60, %v1542_v60  ;;  %vm1342_vm15 = vmor %vm1340_vm3, %vm1341_vm10  ;;  %vm1350_vm14 = vweird.f32 %v1228_v30 }
 0x1b6   : > { %v1313_v17 = vsel %vm1312_vm13, %v1967_v8, %v1309_v49  ;;  %v1336_v32 = vmul.f32 %v1969_v33, %v1335_v48  ;;  %v1531_v12 = vpop.f32.mrf.mxu2 }
 0x1b7   : > { %1575 = vst.msk [vmem:[%s3366_s19 + $0x20] sm:$0xf] %vm1566_vm11, %v1558_v51  ;;  %v1540_v50 = vmul.f32 %v3370_v23, %v1313_v17 }
 0x1b8   : > { %v1337_v47 = vmul.f32 0.5, %v1336_v32 }
 0x1b9   : > { %v1556_v18 = vpack.c.bf16 %v1540_v50, %v1540_v50 }
 0x1ba   : > { %v1338_v54 = vsub.f32 1.5, %v1337_v47 }
 0x1bb   : > { %v1971_v40 = vpop.eup %1970  ;;  %1573 = vst.msk [vmem:[%s3366_s19 + $0x18] sm:$0xf] %vm1566_vm11, %v1556_v18 }
 0x1bc   : > { %v3423_v41 = vpop.xlane.xlu1 %1242  ;;  %v1345_v36 = vmul.f32 %v1971_v40, %v1228_v30  ;;  %v1339_v53 = vmul.f32 %v1969_v33, %v1338_v54  ;;  %vm1351_vm1 = vweird.f32 %v1971_v40 }
 0x1bd   : > { %v3427_v37 = vpop.xlane.xlu2 %1236  ;;  %1972 = vrsqrt.f32 %v3423_v41  ;;  %1452 = vst.msk [vmem:[%s3347_s1 + $0x78] sm:$0xff] %vm1436_vm7, %v3423_v41  ;;  %vm1352_vm12 = vmor %vm1350_vm14, %vm1351_vm1  ;;  %vm1400_vm8 = vweird.f32 %v3423_v41 }
 0x1be   : > { %v1346_v46 = vmul.f32 %v1971_v40, %v1345_v36  ;;  %1974 = vrsqrt.f32 %v3427_v37  ;;  %1450 = vst.msk [vmem:[%s3347_s1 + $0x68] sm:$0xff] %vm1436_vm7, %v3427_v37  ;;  %v1343_v6 = vsel %vm1342_vm15, %v1969_v33, %v1339_v53 }
 0x1bf   : > { %v1231_v63 = vpop.xlane.xlu0 %1230  ;;  %v1543_v55 = vmul.f32 %v3391_v43, %v1343_v6 }
 0x1c0   : > { %1976 = vrsqrt.f32 %v1231_v63  ;;  %1448 = vst.msk [vmem:[%s3347_s1 + $0x58] sm:$0xff] %vm1436_vm7, %v1231_v63  ;;  %v1347_v23 = vmul.f32 0.5, %v1346_v46  ;;  %vm1360_vm0 = vweird.f32 %v1231_v63 }
 0x1c1   : > { %v1559_v62 = vpack.c.bf16 %v1543_v55, %v1543_v55 }
 0x1c2   : > { %v1348_v31 = vsub.f32 1.5, %v1347_v23 }
 0x1c3   : > { %v1973_v24 = vpop.eup %1972  ;;  %1576 = vst.msk [vmem:[%s3366_s19 + $0x24] sm:$0xf] %vm1566_vm11, %v1559_v62 }
 0x1c4   : > { %v1975_v21 = vpop.eup %1974  ;;  %v1349_v16 = vmul.f32 %v1971_v40, %v1348_v31  ;;  %v1395_v35 = vmul.f32 %v1973_v24, %v3423_v41  ;;  %vm1401_vm9 = vweird.f32 %v1973_v24 }
 0x1c5   : > { %v1375_v4 = vmul.f32 %v1975_v21, %v3427_v37  ;;  %vm1381_vm5 = vweird.f32 %v1975_v21  ;;  %vm1402_vm4 = vmor %vm1400_vm8, %vm1401_vm9 }
 0x1c6   : > { %v1977_v52 = vpop.eup %1976  ;;  %v1353_v42 = vsel %vm1352_vm12, %v1971_v40, %v1349_v16  ;;  %v1396_v27 = vmul.f32 %v1973_v24, %v1395_v35 }
 0x1c7   : > { %v1355_v7 = vmul.f32 %v1977_v52, %v1231_v63  ;;  %v1240_v11 = vpop.xlane.xlu0 %1239  ;;  %v1544_v14 = vmul.f32 %v3396_v1, %v1353_v42  ;;  %v1376_v57 = vmul.f32 %v1975_v21, %v1375_v4  ;;  %vm1361_vm2 = vweird.f32 %v1977_v52 }
 0x1c8   : > { %1978 = vrsqrt.f32 %v1240_v11  ;;  %1451 = vst.msk [vmem:[%s3347_s1 + $0x70] sm:$0xff] %vm1436_vm7, %v1240_v11  ;;  %v1397_v3 = vmul.f32 0.5, %v1396_v27  ;;  %vm1380_vm7 = vweird.f32 %v3427_v37  ;;  %vm1362_vm13 = vmor %vm1360_vm0, %vm1361_vm2  ;;  %vm1390_vm3 = vweird.f32 %v1240_v11 }
 0x1c9   : > { %v1356_v19 = vmul.f32 %v1977_v52, %v1355_v7  ;;  %v1560_v43 = vpack.c.bf16 %v1544_v14, %v1544_v14  ;;  %v1377_v26 = vmul.f32 0.5, %v1376_v57  ;;  %vm1382_vm6 = vmor %vm1380_vm7, %vm1381_vm5 }
 0x1ca   : > { %v1398_v61 = vsub.f32 1.5, %v1397_v3 }
 0x1cb   : > { %v1357_v28 = vmul.f32 0.5, %v1356_v19  ;;  %1577 = vst.msk [vmem:[%s3366_s19 + $0x28] sm:$0xf] %vm1566_vm11, %v1560_v43  ;;  %v1378_v9 = vsub.f32 1.5, %v1377_v26 }
 0x1cc   : > { %v1399_v38 = vmul.f32 %v1973_v24, %v1398_v61 }
 0x1cd   : > { %v1358_v1 = vsub.f32 1.5, %v1357_v28  ;;  %v1379_v39 = vmul.f32 %v1975_v21, %v1378_v9 }
 0x1ce   : > { %v1979_v8 = vpop.eup %1978  ;;  %v1403_v13 = vsel %vm1402_vm4, %v1973_v24, %v1399_v38 }
 0x1cf   : > { %v1359_v20 = vmul.f32 %v1977_v52, %v1358_v1  ;;  %v1385_v45 = vmul.f32 %v1979_v8, %v1240_v11  ;;  %v1383_v58 = vsel %vm1382_vm6, %v1975_v21, %v1379_v39  ;;  %v1549_v25 = vmul.f32 %v1531_v12, %v1403_v13 }
 0x1d0   : > { %v1547_v30 = vmul.f32 %v3419_v56, %v1383_v58  ;;  %vm1391_vm10 = vweird.f32 %v1979_v8 }
 0x1d1   : > { %v1363_v22 = vsel %vm1362_vm13, %v1977_v52, %v1359_v20  ;;  %v1386_v59 = vmul.f32 %v1979_v8, %v1385_v45  ;;  %v1565_v34 = vpack.c.bf16 %v1549_v25, %v1549_v25  ;;  %vm1392_vm1 = vmor %vm1390_vm3, %vm1391_vm10 }
 0x1d2   : > { %v1545_v10 = vmul.f32 %v3405_v29, %v1363_v22  ;;  %v1563_v44 = vpack.c.bf16 %v1547_v30, %v1547_v30 }
 0x1d3   : > { %v1387_v0 = vmul.f32 0.5, %v1386_v59  ;;  %1582 = vst.msk [vmem:[%s3366_s19 + $0x3c] sm:$0xf] %vm1566_vm11, %v1565_v34 }
 0x1d4   : > { %v1561_v5 = vpack.c.bf16 %v1545_v10, %v1545_v10  ;;  %1580 = vst.msk [vmem:[%s3366_s19 + $0x34] sm:$0xf] %vm1566_vm11, %v1563_v44 }
 0x1d5   : > { %v1388_v60 = vsub.f32 1.5, %v1387_v0 }
 0x1d6   : > { %1578 = vst.msk [vmem:[%s3366_s19 + $0x2c] sm:$0xf] %vm1566_vm11, %v1561_v5 }
 0x1d7   : > { %v1389_v2 = vmul.f32 %v1979_v8, %v1388_v60 }
 0x1d9   : > { %v1393_v56 = vsel %vm1392_vm1, %v1979_v8, %v1389_v2 }
 0x1da   : > { %v1548_v33 = vmul.f32 %v3442_v15, %v1393_v56 }
 0x1dc   : > { %v1564_v29 = vpack.c.bf16 %v1548_v33, %v1548_v33 }
 0x1de   : > { %1581 = vst.msk [vmem:[%s3366_s19 + $0x38] sm:$0xf] %vm1566_vm11, %v1564_v29 }
 0x1df PF: > { %p1912_p4 = scmp.ge.s32.totalorder %s2042_s27, 2  ;;  %s1632_s1 = sand.u32 1, %s2030_s24  }
 0x1e0   : > { %s1633_s8 = scalar_lea.sflag [#allocation3], %s1632_s1 }
 0x1e1   : > { %p1909_p5 = pnand %p1912_p4, %p2129_p6 }
 0x1e3   : > { %p1910_p7 = pneg %p1909_p5 }
 0x1e5   : > { %2025 = dma.done.wait (%p1910_p7), %s1633_s8, 2048  }
 0x1e6   : > { %2027 = vsyncadd (%p1910_p7), %s1633_s8, 4294965248  ;;  %p18_p8 = scmp.ge.s32.totalorder %s2112_s30, 4   ;;  %s3653_s24 = smov %s2034_s25 }
 0x1e7   : > { %s3654_s25 = smov %s2038_s26  ;;  %s3655_s26 = smov %s2123_s10 }
 0x1e8   : > { %s3656_s27 = smov %s2112_s30  ;;  %20 = sbr.rel (!%p18_p8) target bundleno = 6 (0x6), region = 102 }
 0x1ed   :  { %1655 = vsyncpa [#allocation3], 1 }
 0x1ee   :  { %1657 = vsyncpa [#allocation3 + $0x1], 1 }

</bundles_post_ra>
